<compile_context>
chip_gen: v6e
topology: v6e:2x2x1
jax: 0.10.0
libtpu: 0.0.40
codegen_flags: <defaults>
</compile_context>

<pallas_src>
import math
from functools import partial

import jax
import jax.numpy as jnp
from jax.experimental import pallas as pl
from jax.experimental.pallas import tpu as pltpu

_LN_EPS = 1e-5                  # PyTorch LayerNorm default eps
_DOT_DTYPE = jnp.bfloat16       # MXU operand dtype (f32 accumulation everywhere)


# ---------------------------------------------------------------------------
# In-kernel helpers (pure elementwise / reductions; all math in f32)
# ---------------------------------------------------------------------------
def _layernorm(h):
    mean = jnp.mean(h, axis=-1, keepdims=True)
    var = jnp.mean((h - mean) ** 2, axis=-1, keepdims=True)
    return (h - mean) * jax.lax.rsqrt(var + _LN_EPS)


def _erf(x):
    # Abramowitz & Stegun 7.1.26 (|err| < 1.5e-7); matches PyTorch's erf GELU
    # to f32 noise without relying on a lax.erf Mosaic lowering.
    a1, a2, a3, a4, a5 = 0.254829592, -0.284496736, 1.421413741, -1.453152027, 1.061405429
    p = 0.3275911
    sgn = jnp.where(x >= 0.0, 1.0, -1.0)
    ax = jnp.abs(x)
    t = 1.0 / (1.0 + p * ax)
    poly = ((((a5 * t + a4) * t + a3) * t + a2) * t + a1) * t
    return sgn * (1.0 - poly * jnp.exp(-ax * ax))


def _gelu(x):
    return 0.5 * x * (1.0 + _erf(x * (1.0 / math.sqrt(2.0))))


def _silu(x):
    return x * jax.nn.sigmoid(x)


# ---------------------------------------------------------------------------
# Pallas kernels
# ---------------------------------------------------------------------------
def embed_enc_kernel(x_ref, wemb_ref, bemb_ref, wih_ref, bih_ref, xe_ref, gx_ref):
    """Embedding ((x-mean)/std folded into wemb/bemb) -> LayerNorm,
    plus the hoisted encoder-GRU input projection x @ W_ih + b_ih (r|z|n)."""
    h = jnp.dot(x_ref[...].astype(wemb_ref.dtype), wemb_ref[...],
                preferred_element_type=jnp.float32) + bemb_ref[...]
    xe = _layernorm(h)
    xe_ref[...] = xe
    gx_ref[...] = jnp.dot(xe.astype(wih_ref.dtype), wih_ref[...],
                          preferred_element_type=jnp.float32) + bih_ref[...]


def gru_kernel(gx_ref, h0_ref, whh_ref, bhh_ref, out_ref, h_scr):
    """One PyTorch-semantics GRU step per grid iteration.

    Input-gate pre-activations (x@W_ih + b_ih) are precomputed outside the
    loop; the body does a single (B,H)@(H,3H) matmul for the hidden path.
    The full (T,B,H) sequence output is a resident block written back once.
    """
    t = pl.program_id(0)

    @pl.when(t == 0)
    def _():
        h_scr[...] = h0_ref[...]

    h = h_scr[...]                       # (B, H) f32
    gx = gx_ref[0]                       # (B, 3H) precomputed, f32
    gh = jnp.dot(h.astype(whh_ref.dtype), whh_ref[...],
                 preferred_element_type=jnp.float32) + bhh_ref[...]

    H = h.shape[-1]
    r = jax.nn.sigmoid(gx[:, :H] + gh[:, :H])
    u = jax.nn.sigmoid(gx[:, H:2 * H] + gh[:, H:2 * H])
    n = jnp.tanh(gx[:, 2 * H:] + r * gh[:, 2 * H:])   # b_hn stays inside r*(...)
    h_new = (1.0 - u) * n + u * h

    h_scr[...] = h_new
    out_ref[t] = h_new


def head_fused_kernel(xe_ref, mem_ref, eps_ref,
                      w1_ref, b1_ref, w2_ref, b2_ref, wdec_ref, bdec_ref,
                      memory_ref, muz_ref, gdec_ref):
    """memory = SiLU(xe + LN(mem));
    [mu|logvar] = blockdiag-Lin(GELU(LN per half(Lin_cat(memory))));
    z = mu + (exp(0.5*logvar)+1e-5)*eps;  decoder gates = z @ W_ih_dec + b."""
    H = xe_ref.shape[-1]
    memory = _silu(xe_ref[...] + _layernorm(mem_ref[...]))
    memory_ref[...] = memory

    h = jnp.dot(memory.astype(w1_ref.dtype), w1_ref[...],
                preferred_element_type=jnp.float32) + b1_ref[...]        # (M, 2H)
    g = jnp.concatenate([_gelu(_layernorm(h[:, :H])),
                         _gelu(_layernorm(h[:, H:]))], axis=-1)          # (M, 2H)
    ml = jnp.dot(g.astype(w2_ref.dtype), w2_ref[...],
                 preferred_element_type=jnp.float32) + b2_ref[...]       # (M, 2H)

    mu = ml[:, :H]
    logvar = ml[:, H:]
    sigma = jnp.exp(0.5 * logvar) + 1e-5
    z = mu + sigma * eps_ref[...]

    muz_ref[...] = jnp.concatenate([mu, z], axis=-1)                     # lane-dense 2H
    gdec_ref[...] = jnp.dot(z.astype(wdec_ref.dtype), wdec_ref[...],
                            preferred_element_type=jnp.float32) + bdec_ref[...]


def out_fc_kernel(z_ref, dec_ref, wfc_ref, bfc_ref, o_ref):
    """out = fc(factor * SiLU(z + LN(dec)));  `factor` folded into wfc, output
    lane-padded to a multiple of 128 (sliced in the wrapper)."""
    s = _silu(z_ref[...] + _layernorm(dec_ref[...]))
    o_ref[...] = jnp.dot(s.astype(wfc_ref.dtype), wfc_ref[...],
                         preferred_element_type=jnp.float32) + bfc_ref[...]


# ---------------------------------------------------------------------------
# pallas_call wrappers
# ---------------------------------------------------------------------------
def _row_grid_call(kernel, *, m, row_inputs, full_inputs, out_dims, tile_m=None):
    """Dense/elementwise kernels on (m, d) slabs with a parallel row grid."""
    if tile_m is None:
        tile_m = min(m, 512)                       # keeps VMEM modest when m grows (v7x: 64 MiB)
    if (m % tile_m != 0) or (tile_m != m and tile_m % 8 != 0):
        tile_m = m                                 # fall back to a single whole-slab block
    grid = (m // tile_m,)

    in_specs = [pl.BlockSpec((tile_m, a.shape[-1]), lambda i: (i, 0)) for a in row_inputs]
    in_specs += [pl.BlockSpec(a.shape, lambda i, nd=a.ndim: (0,) * nd) for a in full_inputs]

    out_shape = tuple(jax.ShapeDtypeStruct((m, d), jnp.float32) for d in out_dims)
    out_specs = tuple(pl.BlockSpec((tile_m, d), lambda i: (i, 0)) for d in out_dims)
    if len(out_dims) == 1:
        out_shape, out_specs = out_shape[0], out_specs[0]

    return pl.pallas_call(
        kernel,
        out_shape=out_shape,
        grid=grid,
        in_specs=in_specs,
        out_specs=out_specs,
        compiler_params=pltpu.CompilerParams(dimension_semantics=("parallel",)),
    )(*row_inputs, *full_inputs)


def _run_gru(gx_tm, h0, whh, bhh):
    """Single-layer GRU over a time-major precomputed-gate tensor (T, B, 3H)."""
    T, B, H3 = gx_tm.shape
    H = h0.shape[-1]
    return pl.pallas_call(
        gru_kernel,
        out_shape=jax.ShapeDtypeStruct((T, B, H), jnp.float32),
        grid_spec=pltpu.PrefetchScalarGridSpec(
            num_scalar_prefetch=0,
            grid=(T,),
            in_specs=[
                pl.BlockSpec((1, B, H3), lambda t: (t, 0, 0)),   # per-step gates
                pl.BlockSpec((B, H), lambda t: (0, 0)),          # h0 (resident)
                pl.BlockSpec((H, H3), lambda t: (0, 0)),         # W_hh (r|z|n)
                pl.BlockSpec((1, H3), lambda t: (0, 0)),         # b_hh
            ],
            # resident output: written in VMEM every step, DMA'd to HBM once
            out_specs=pl.BlockSpec((T, B, H), lambda t: (0, 0, 0)),
            scratch_shapes=[pltpu.VMEM((B, H), jnp.float32)],
        ),
        compiler_params=pltpu.CompilerParams(dimension_semantics=("arbitrary",)),
    )(gx_tm, h0, whh, bhh)


# ---------------------------------------------------------------------------
# Deterministic parameter init (xavier_normal for weights, as in _init_weights)
# ---------------------------------------------------------------------------
def _xavier(key, fan_out, fan_in):
    std = math.sqrt(2.0 / (fan_in + fan_out))
    return (std * jax.random.normal(key, (fan_out, fan_in), jnp.float32)).T   # (in, out)


def init_params(key, input_dim, emb_dim, hidden_dim, output_dim, init_bias):
    keys = jax.random.split(key, 10)
    H = hidden_dim
    p = {}
    p["emb_w"] = _xavier(keys[0], emb_dim, input_dim)           # (Din, E)
    p["emb_b"] = jnp.zeros((1, emb_dim), jnp.float32)

    def gru_params(k1, k2, in_dim):
        wih = jnp.concatenate([_xavier(k, H, in_dim) for k in jax.random.split(k1, 3)], axis=1)  # (in, 3H) r|z|n
        whh = jnp.concatenate([_xavier(k, H, H) for k in jax.random.split(k2, 3)], axis=1)       # (H, 3H)
        bih = jnp.zeros((1, 3 * H), jnp.float32)
        bhh = jnp.zeros((1, 3 * H), jnp.float32)
        return wih, whh, bih, bhh

    p["enc_wih"], p["enc_whh"], p["enc_bih"], p["enc_bhh"] = gru_params(keys[1], keys[2], emb_dim)
    p["dec_wih"], p["dec_whh"], p["dec_bih"], p["dec_bhh"] = gru_params(keys[3], keys[4], H)

    # fc_enc_mu / fc_enc_logvar are hard-coded Linear(64, 64) in the module.
    for name, k1, k2 in (("mu", keys[5], keys[6]), ("lv", keys[7], keys[8])):
        p[f"{name}_w1"] = _xavier(k1, 64, 64)
        p[f"{name}_b1"] = jnp.zeros((1, 64), jnp.float32)
        p[f"{name}_w2"] = _xavier(k2, 64, 64)
        p[f"{name}_b2"] = jnp.zeros((1, 64), jnp.float32)

    p["fc_w"] = _xavier(keys[9], output_dim, H)                  # (H, Dout)
    p["fc_b"] = jnp.full((1, output_dim), init_bias, jnp.float32)
    return p


# ---------------------------------------------------------------------------
# Trace-time parameter preparation (folds / concatenations / dtype casts)
# ---------------------------------------------------------------------------
def _prepare(params, mean_val, std_val, factor, dot_dtype):
    H = params["enc_whh"].shape[0]
    Dout = params["fc_w"].shape[1]
    q = {}

    # Fold (x - mean)/std into the embedding linear:
    #   ((x-mean)/std) @ W + b  ==  x @ (W/std) + (b - (mean/std) * colsum(W))
    w = params["emb_w"]
    q["emb_w"] = (w / std_val).astype(dot_dtype)
    q["emb_b"] = params["emb_b"] - (mean_val / std_val) * jnp.sum(w, axis=0, keepdims=True)

    for pfx in ("enc", "dec"):
        q[f"{pfx}_wih"] = params[f"{pfx}_wih"].astype(dot_dtype)
        q[f"{pfx}_bih"] = params[f"{pfx}_bih"]
        q[f"{pfx}_whh"] = params[f"{pfx}_whh"].astype(dot_dtype)
        q[f"{pfx}_bhh"] = params[f"{pfx}_bhh"]

    # mu / logvar heads fused: first matmul column-concatenated, second block-diagonal.
    q["head_w1"] = jnp.concatenate([params["mu_w1"], params["lv_w1"]], axis=1).astype(dot_dtype)  # (64,128)
    q["head_b1"] = jnp.concatenate([params["mu_b1"], params["lv_b1"]], axis=1)                    # (1,128)
    z64 = jnp.zeros((64, 64), jnp.float32)
    w2blk = jnp.concatenate(
        [jnp.concatenate([params["mu_w2"], z64], axis=1),
         jnp.concatenate([z64, params["lv_w2"]], axis=1)], axis=0)                                # (128,128)
    q["head_w2"] = w2blk.astype(dot_dtype)
    q["head_b2"] = jnp.concatenate([params["mu_b2"], params["lv_b2"]], axis=1)

    # fc with `factor` folded in, lane-padded to 128 for unmasked stores.
    npad = max(128, ((Dout + 127) // 128) * 128)
    wfc = jnp.zeros((H, npad), jnp.float32).at[:, :Dout].set(factor * params["fc_w"])
    bfc = jnp.zeros((1, npad), jnp.float32).at[:, :Dout].set(params["fc_b"])
    q["fc_w"] = wfc.astype(dot_dtype)
    q["fc_b"] = bfc
    return q


# ---------------------------------------------------------------------------
# Forward pass
# ---------------------------------------------------------------------------
def vgru_ed_forward(x, params, eps, *, mean_val, std_val, factor=-1.0,
                    dot_dtype=_DOT_DTYPE):
    # TODO(synk): n_layers > 1 GRU stacking (with inter-layer dropout) not implemented; n_layers=1.
    B, T, Din = x.shape
    E = params["emb_w"].shape[1]
    H = params["enc_whh"].shape[0]
    Dout = params["fc_w"].shape[1]
    assert H == 64 and E == 64, "fc_enc_mu/logvar are hard-coded Linear(64,64) in the module"
    M = T * B

    q = _prepare(params, mean_val, std_val, factor, dot_dtype)

    # Time-major flattening end to end (only the tiny model inputs get transposed).
    x_tm = jnp.transpose(x, (1, 0, 2)).reshape(M, Din)
    eps_tm = jnp.transpose(eps, (1, 0, 2)).reshape(M, H)

    # 1) embedding + LayerNorm + hoisted encoder input projection
    xe_flat, gx_enc = _row_grid_call(
        embed_enc_kernel, m=M,
        row_inputs=[x_tm],
        full_inputs=[q["emb_w"], q["emb_b"], q["enc_wih"], q["enc_bih"]],
        out_dims=(E, 3 * H))

    # 2) encoder GRU (recurrent hidden path only)
    enc_out = _run_gru(gx_enc.reshape(T, B, 3 * H),
                       jnp.zeros((B, H), jnp.float32), q["enc_whh"], q["enc_bhh"])
    ctx = enc_out[T - 1]                                      # context (n_layers=1)

    # 3) residual + heads + reparam + hoisted decoder input projection (fused)
    memory_flat, muz_flat, gx_dec = _row_grid_call(
        head_fused_kernel, m=M,
        row_inputs=[xe_flat, enc_out.reshape(M, H), eps_tm],
        full_inputs=[q["head_w1"], q["head_b1"], q["head_w2"], q["head_b2"],
                     q["dec_wih"], q["dec_bih"]],
        out_dims=(H, 2 * H, 3 * H))
    mu_flat = muz_flat[:, :H]
    z_flat = muz_flat[:, H:]

    # 4) decoder GRU
    dec_out = _run_gru(gx_dec.reshape(T, B, 3 * H), ctx, q["dec_whh"], q["dec_bhh"])

    # 5) residual + SiLU + fc (factor folded, padded lane-dense output)
    out_pad = _row_grid_call(
        out_fc_kernel, m=M,
        row_inputs=[z_flat, dec_out.reshape(M, H)],
        full_inputs=[q["fc_w"], q["fc_b"]],
        out_dims=(q["fc_w"].shape[1],))
    out_flat = out_pad[:, :Dout]

    def _unflatten(a):  # (T*B, d) time-major -> (B, T, d) batch-first
        return jnp.transpose(a.reshape(T, B, -1), (1, 0, 2))

    return (_unflatten(out_flat), _unflatten(memory_flat),
            _unflatten(mu_flat), _unflatten(z_flat))


# ---------------------------------------------------------------------------
if __name__ == "__main__":
    B, T = 2, 8
    input_dim, emb_dim, hidden_dim, output_dim = 4, 64, 64, 4   # fc_enc_* require 64
    mean_val, std_val = 2.0, 3.0
    init_bias = 0.1

    key = jax.random.PRNGKey(0)
    k_x, k_eps, k_params = jax.random.split(key, 3)
    x = jax.random.normal(k_x, (B, T, input_dim), jnp.float32) * std_val + mean_val
    eps = jax.random.normal(k_eps, (B, T, hidden_dim), jnp.float32)   # reparam noise
    params = init_params(k_params, input_dim, emb_dim, hidden_dim, output_dim, init_bias)

    fwd = jax.jit(partial(vgru_ed_forward, mean_val=mean_val, std_val=std_val))
    out, memory, mu, z = fwd(x, params, eps)
    jax.block_until_ready((out, memory, mu, z))

    assert out.shape == (B, T, output_dim)
    assert memory.shape == (B, T, hidden_dim)
    assert mu.shape == (B, T, 64)
    assert z.shape == (B, T, hidden_dim)
    assert all(bool(jnp.all(jnp.isfinite(a))) for a in (out, memory, mu, z))
    print("KERNEL_OK")
</pallas_src>

<mosaic_0001>
module attributes {stable_mosaic.version = 11 : i64} {
  func.func @embed_enc_kernel(%arg0: i32, %arg1: memref<16x4xf32, #tpu.memory_space<vmem>>, %arg2: memref<4x64xbf16, #tpu.memory_space<vmem>>, %arg3: memref<1x64xf32, #tpu.memory_space<vmem>>, %arg4: memref<64x192xbf16, #tpu.memory_space<vmem>>, %arg5: memref<1x192xf32, #tpu.memory_space<vmem>>, %arg6: memref<16x64xf32, #tpu.memory_space<vmem>>, %arg7: memref<16x192xf32, #tpu.memory_space<vmem>>) attributes {dimension_semantics = [#tpu.dimension_semantics<parallel>], iteration_bounds = array<i64: 1>, scalar_prefetch = 0 : i64, scratch_operands = 0 : i64, tpu.core_type = #tpu.core_type<tc>, window_params = [{transform_indices = @transform_0, window_bounds = array<i64: 16, 4>}, {pipeline_mode = #tpu.pipeline_mode<synchronous>, transform_indices = @transform_1, window_bounds = array<i64: 4, 64>}, {pipeline_mode = #tpu.pipeline_mode<synchronous>, transform_indices = @transform_2, window_bounds = array<i64: 1, 64>}, {pipeline_mode = #tpu.pipeline_mode<synchronous>, transform_indices = @transform_3, window_bounds = array<i64: 64, 192>}, {pipeline_mode = #tpu.pipeline_mode<synchronous>, transform_indices = @transform_4, window_bounds = array<i64: 1, 192>}, {transform_indices = @transform_5, window_bounds = array<i64: 16, 64>}, {transform_indices = @transform_6, window_bounds = array<i64: 16, 192>}]} {
    %c0 = arith.constant 0 : index
    %c0_0 = arith.constant 0 : index
    %0 = vector.load %arg1[%c0, %c0_0] : memref<16x4xf32, #tpu.memory_space<vmem>>, vector<16x4xf32>
    %1 = arith.truncf %0 : vector<16x4xf32> to vector<16x4xbf16>
    %c0_1 = arith.constant 0 : index
    %c0_2 = arith.constant 0 : index
    %2 = vector.load %arg2[%c0_1, %c0_2] : memref<4x64xbf16, #tpu.memory_space<vmem>>, vector<4x64xbf16>
    %cst = arith.constant dense<0.000000e+00> : vector<16x64xf32>
    %3 = tpu.matmul %1, %2, %cst {dimension_numbers = #tpu.dot_dimension_numbers<[1], [0], [0], [1], [0, 0, 1, 1], [], []>} : vector<16x4xbf16>, vector<4x64xbf16>, vector<16x64xf32> -> vector<16x64xf32>
    %c0_3 = arith.constant 0 : index
    %c0_4 = arith.constant 0 : index
    %4 = vector.load %arg3[%c0_3, %c0_4] : memref<1x64xf32, #tpu.memory_space<vmem>>, vector<1x64xf32>
    %5 = vector.broadcast %4 : vector<1x64xf32> to vector<16x64xf32>
    %6 = arith.addf %3, %5 : vector<16x64xf32>
    %cst_5 = arith.constant dense<0.000000e+00> : vector<16xf32>
    %7 = vector.multi_reduction <add>, %6, %cst_5 [1] : vector<16x64xf32> to vector<16xf32>
    %8 = vector.shape_cast %7 : vector<16xf32> to vector<16x1xf32>
    %cst_6 = arith.constant 6.400000e+01 : f32
    %9 = vector.broadcast %cst_6 : f32 to vector<16x1xf32>
    %10 = arith.divf %8, %9 : vector<16x1xf32>
    %11 = vector.broadcast %10 : vector<16x1xf32> to vector<16x64xf32>
    %12 = arith.subf %6, %11 : vector<16x64xf32>
    %13 = arith.mulf %12, %12 : vector<16x64xf32>
    %cst_7 = arith.constant dense<0.000000e+00> : vector<16xf32>
    %14 = vector.multi_reduction <add>, %13, %cst_7 [1] : vector<16x64xf32> to vector<16xf32>
    %15 = vector.shape_cast %14 : vector<16xf32> to vector<16x1xf32>
    %cst_8 = arith.constant 6.400000e+01 : f32
    %16 = vector.broadcast %cst_8 : f32 to vector<16x1xf32>
    %17 = arith.divf %15, %16 : vector<16x1xf32>
    %18 = vector.broadcast %10 : vector<16x1xf32> to vector<16x64xf32>
    %19 = arith.subf %6, %18 : vector<16x64xf32>
    %cst_9 = arith.constant 9.99999974E-6 : f32
    %20 = vector.broadcast %cst_9 : f32 to vector<16x1xf32>
    %21 = arith.addf %17, %20 : vector<16x1xf32>
    %22 = math.rsqrt %21 : vector<16x1xf32>
    %23 = vector.broadcast %22 : vector<16x1xf32> to vector<16x64xf32>
    %24 = arith.mulf %19, %23 : vector<16x64xf32>
    %c0_10 = arith.constant 0 : index
    %c0_11 = arith.constant 0 : index
    %25 = vector.load %arg6[%c0_10, %c0_11] : memref<16x64xf32, #tpu.memory_space<vmem>>, vector<16x64xf32>
    tpu.vector_store %arg6[%c0_10, %c0_11], %24 {strides = array<i32>} : memref<16x64xf32, #tpu.memory_space<vmem>>, vector<16x64xf32>,
    %26 = arith.truncf %24 : vector<16x64xf32> to vector<16x64xbf16>
    %c0_12 = arith.constant 0 : index
    %c0_13 = arith.constant 0 : index
    %27 = vector.load %arg4[%c0_12, %c0_13] : memref<64x192xbf16, #tpu.memory_space<vmem>>, vector<64x192xbf16>
    %cst_14 = arith.constant dense<0.000000e+00> : vector<16x192xf32>
    %28 = tpu.matmul %26, %27, %cst_14 {dimension_numbers = #tpu.dot_dimension_numbers<[1], [0], [0], [1], [0, 0, 1, 1], [], []>} : vector<16x64xbf16>, vector<64x192xbf16>, vector<16x192xf32> -> vector<16x192xf32>
    %c0_15 = arith.constant 0 : index
    %c0_16 = arith.constant 0 : index
    %29 = vector.load %arg5[%c0_15, %c0_16] : memref<1x192xf32, #tpu.memory_space<vmem>>, vector<1x192xf32>
    %30 = vector.broadcast %29 : vector<1x192xf32> to vector<16x192xf32>
    %31 = arith.addf %28, %30 : vector<16x192xf32>
    %c0_17 = arith.constant 0 : index
    %c0_18 = arith.constant 0 : index
    %32 = vector.load %arg7[%c0_17, %c0_18] : memref<16x192xf32, #tpu.memory_space<vmem>>, vector<16x192xf32>
    tpu.vector_store %arg7[%c0_17, %c0_18], %31 {strides = array<i32>} : memref<16x192xf32, #tpu.memory_space<vmem>>, vector<16x192xf32>,
    return
  }
  func.func @transform_0(%arg0: i32) -> (i32, i32) {
    %c0_i32 = arith.constant 0 : i32
    %c0_i32_0 = arith.constant 0 : i32
    return %arg0, %c0_i32 : i32, i32
  }
  func.func @transform_1(%arg0: i32) -> (i32, i32) {
    %c0_i32 = arith.constant 0 : i32
    %c0_i32_0 = arith.constant 0 : i32
    %c0_i32_1 = arith.constant 0 : i32
    return %c0_i32, %c0_i32_0 : i32, i32
  }
  func.func @transform_2(%arg0: i32) -> (i32, i32) {
    %c0_i32 = arith.constant 0 : i32
    %c0_i32_0 = arith.constant 0 : i32
    %c0_i32_1 = arith.constant 0 : i32
    return %c0_i32, %c0_i32_0 : i32, i32
  }
  func.func @transform_3(%arg0: i32) -> (i32, i32) {
    %c0_i32 = arith.constant 0 : i32
    %c0_i32_0 = arith.constant 0 : i32
    %c0_i32_1 = arith.constant 0 : i32
    return %c0_i32, %c0_i32_0 : i32, i32
  }
  func.func @transform_4(%arg0: i32) -> (i32, i32) {
    %c0_i32 = arith.constant 0 : i32
    %c0_i32_0 = arith.constant 0 : i32
    %c0_i32_1 = arith.constant 0 : i32
    return %c0_i32, %c0_i32_0 : i32, i32
  }
  func.func @transform_5(%arg0: i32) -> (i32, i32) {
    %c0_i32 = arith.constant 0 : i32
    %c0_i32_0 = arith.constant 0 : i32
    return %arg0, %c0_i32 : i32, i32
  }
  func.func @transform_6(%arg0: i32) -> (i32, i32) {
    %c0_i32 = arith.constant 0 : i32
    %c0_i32_0 = arith.constant 0 : i32
    return %arg0, %c0_i32 : i32, i32
  }
}

module attributes {stable_mosaic.version = 11 : i64} {
  func.func @gru_kernel(%arg0: i32, %arg1: memref<1x2x192xf32, #tpu.memory_space<vmem>>, %arg2: memref<2x64xf32, #tpu.memory_space<vmem>>, %arg3: memref<64x192xbf16, #tpu.memory_space<vmem>>, %arg4: memref<1x192xf32, #tpu.memory_space<vmem>>, %arg5: memref<8x2x64xf32, #tpu.memory_space<vmem>>, %arg6: memref<2x64xf32, #tpu.memory_space<vmem>>) attributes {dimension_semantics = [#tpu.dimension_semantics<arbitrary>], iteration_bounds = array<i64: 8>, scalar_prefetch = 0 : i64, scratch_operands = 1 : i64, tpu.core_type = #tpu.core_type<tc>, window_params = [{transform_indices = @transform_0, window_bounds = array<i64: 1, 2, 192>}, {pipeline_mode = #tpu.pipeline_mode<synchronous>, transform_indices = @transform_1, window_bounds = array<i64: 2, 64>}, {pipeline_mode = #tpu.pipeline_mode<synchronous>, transform_indices = @transform_2, window_bounds = array<i64: 64, 192>}, {pipeline_mode = #tpu.pipeline_mode<synchronous>, transform_indices = @transform_3, window_bounds = array<i64: 1, 192>}, {pipeline_mode = #tpu.pipeline_mode<synchronous>, transform_indices = @transform_4, window_bounds = array<i64: 8, 2, 64>}]} {
    %c0_i32 = arith.constant 0 : i32
    %0 = arith.cmpi eq, %arg0, %c0_i32 : i32
    %1 = arith.extui %0 : i1 to i32
    %c0_i32_0 = arith.constant 0 : i32
    %2 = arith.cmpi ne, %1, %c0_i32_0 : i32
    scf.if %2 {
      %c0_16 = arith.constant 0 : index
      %c0_17 = arith.constant 0 : index
      %43 = vector.load %arg2[%c0_16, %c0_17] : memref<2x64xf32, #tpu.memory_space<vmem>>, vector<2x64xf32>
      %c0_18 = arith.constant 0 : index
      %c0_19 = arith.constant 0 : index
      %44 = vector.load %arg6[%c0_18, %c0_19] : memref<2x64xf32, #tpu.memory_space<vmem>>, vector<2x64xf32>
      tpu.vector_store %arg6[%c0_18, %c0_19], %43 {strides = array<i32>} : memref<2x64xf32, #tpu.memory_space<vmem>>, vector<2x64xf32>,
    } else {
    }
    %c0 = arith.constant 0 : index
    %c0_1 = arith.constant 0 : index
    %3 = vector.load %arg6[%c0, %c0_1] : memref<2x64xf32, #tpu.memory_space<vmem>>, vector<2x64xf32>
    %c0_2 = arith.constant 0 : index
    %c0_3 = arith.constant 0 : index
    %c0_4 = arith.constant 0 : index
    %4 = vector.load %arg1[%c0_2, %c0_3, %c0_4] : memref<1x2x192xf32, #tpu.memory_space<vmem>>, vector<1x2x192xf32>
    %5 = vector.shape_cast %4 : vector<1x2x192xf32> to vector<2x192xf32>
    %6 = arith.truncf %3 : vector<2x64xf32> to vector<2x64xbf16>
    %c0_5 = arith.constant 0 : index
    %c0_6 = arith.constant 0 : index
    %7 = vector.load %arg3[%c0_5, %c0_6] : memref<64x192xbf16, #tpu.memory_space<vmem>>, vector<64x192xbf16>
    %cst = arith.constant dense<0.000000e+00> : vector<2x192xf32>
    %8 = tpu.matmul %6, %7, %cst {dimension_numbers = #tpu.dot_dimension_numbers<[1], [0], [0], [1], [0, 0, 1, 1], [], []>} : vector<2x64xbf16>, vector<64x192xbf16>, vector<2x192xf32> -> vector<2x192xf32>
    %c0_7 = arith.constant 0 : index
    %c0_8 = arith.constant 0 : index
    %9 = vector.load %arg4[%c0_7, %c0_8] : memref<1x192xf32, #tpu.memory_space<vmem>>, vector<1x192xf32>
    %10 = vector.broadcast %9 : vector<1x192xf32> to vector<2x192xf32>
    %11 = arith.addf %8, %10 : vector<2x192xf32>
    %12 = vector.extract_strided_slice %5 {offsets = [0, 0], sizes = [2, 64], strides = [1, 1]} : vector<2x192xf32> to vector<2x64xf32>
    %13 = vector.extract_strided_slice %11 {offsets = [0, 0], sizes = [2, 64], strides = [1, 1]} : vector<2x192xf32> to vector<2x64xf32>
    %14 = arith.addf %12, %13 : vector<2x64xf32>
    %15 = arith.negf %14 : vector<2x64xf32>
    %16 = math.exp %15 : vector<2x64xf32>
    %cst_9 = arith.constant 1.000000e+00 : f32
    %17 = vector.broadcast %cst_9 : f32 to vector<2x64xf32>
    %18 = arith.addf %17, %16 : vector<2x64xf32>
    %19 = arith.divf %17, %18 : vector<2x64xf32>
    %20 = vector.extract_strided_slice %5 {offsets = [0, 64], sizes = [2, 64], strides = [1, 1]} : vector<2x192xf32> to vector<2x64xf32>
    %21 = vector.extract_strided_slice %11 {offsets = [0, 64], sizes = [2, 64], strides = [1, 1]} : vector<2x192xf32> to vector<2x64xf32>
    %22 = arith.addf %20, %21 : vector<2x64xf32>
    %23 = arith.negf %22 : vector<2x64xf32>
    %24 = math.exp %23 : vector<2x64xf32>
    %cst_10 = arith.constant 1.000000e+00 : f32
    %25 = vector.broadcast %cst_10 : f32 to vector<2x64xf32>
    %26 = arith.addf %25, %24 : vector<2x64xf32>
    %27 = arith.divf %25, %26 : vector<2x64xf32>
    %28 = vector.extract_strided_slice %5 {offsets = [0, 128], sizes = [2, 64], strides = [1, 1]} : vector<2x192xf32> to vector<2x64xf32>
    %29 = vector.extract_strided_slice %11 {offsets = [0, 128], sizes = [2, 64], strides = [1, 1]} : vector<2x192xf32> to vector<2x64xf32>
    %30 = arith.mulf %19, %29 : vector<2x64xf32>
    %31 = arith.addf %28, %30 : vector<2x64xf32>
    %32 = math.tanh %31 : vector<2x64xf32>
    %cst_11 = arith.constant 1.000000e+00 : f32
    %33 = vector.broadcast %cst_11 : f32 to vector<2x64xf32>
    %34 = arith.subf %33, %27 : vector<2x64xf32>
    %35 = arith.mulf %34, %32 : vector<2x64xf32>
    %36 = arith.mulf %27, %3 : vector<2x64xf32>
    %37 = arith.addf %35, %36 : vector<2x64xf32>
    %c0_12 = arith.constant 0 : index
    %c0_13 = arith.constant 0 : index
    %38 = vector.load %arg6[%c0_12, %c0_13] : memref<2x64xf32, #tpu.memory_space<vmem>>, vector<2x64xf32>
    tpu.vector_store %arg6[%c0_12, %c0_13], %37 {strides = array<i32>} : memref<2x64xf32, #tpu.memory_space<vmem>>, vector<2x64xf32>,
    %39 = arith.index_cast %arg0 : i32 to index
    %c0_14 = arith.constant 0 : index
    %c0_15 = arith.constant 0 : index
    %40 = vector.load %arg5[%39, %c0_14, %c0_15] : memref<8x2x64xf32, #tpu.memory_space<vmem>>, vector<1x2x64xf32>
    %41 = vector.shape_cast %40 : vector<1x2x64xf32> to vector<2x64xf32>
    %42 = vector.shape_cast %37 : vector<2x64xf32> to vector<1x2x64xf32>
    tpu.vector_store %arg5[%39, %c0_14, %c0_15], %42 {strides = array<i32>} : memref<8x2x64xf32, #tpu.memory_space<vmem>>, vector<1x2x64xf32>,
    return
  }
  func.func @transform_0(%arg0: i32) -> (i32, i32, i32) {
    %c0_i32 = arith.constant 0 : i32
    %c0_i32_0 = arith.constant 0 : i32
    %c0_i32_1 = arith.constant 0 : i32
    return %arg0, %c0_i32, %c0_i32_0 : i32, i32, i32
  }
  func.func @transform_1(%arg0: i32) -> (i32, i32) {
    %c0_i32 = arith.constant 0 : i32
    %c0_i32_0 = arith.constant 0 : i32
    %c0_i32_1 = arith.constant 0 : i32
    return %c0_i32, %c0_i32_0 : i32, i32
  }
  func.func @transform_2(%arg0: i32) -> (i32, i32) {
    %c0_i32 = arith.constant 0 : i32
    %c0_i32_0 = arith.constant 0 : i32
    %c0_i32_1 = arith.constant 0 : i32
    return %c0_i32, %c0_i32_0 : i32, i32
  }
  func.func @transform_3(%arg0: i32) -> (i32, i32) {
    %c0_i32 = arith.constant 0 : i32
    %c0_i32_0 = arith.constant 0 : i32
    %c0_i32_1 = arith.constant 0 : i32
    return %c0_i32, %c0_i32_0 : i32, i32
  }
  func.func @transform_4(%arg0: i32) -> (i32, i32, i32) {
    %c0_i32 = arith.constant 0 : i32
    %c0_i32_0 = arith.constant 0 : i32
    %c0_i32_1 = arith.constant 0 : i32
    %c0_i32_2 = arith.constant 0 : i32
    return %c0_i32, %c0_i32_0, %c0_i32_1 : i32, i32, i32
  }
}

module attributes {stable_mosaic.version = 11 : i64} {
  func.func @head_fused_kernel(%arg0: i32, %arg1: memref<16x64xf32, #tpu.memory_space<vmem>>, %arg2: memref<16x64xf32, #tpu.memory_space<vmem>>, %arg3: memref<16x64xf32, #tpu.memory_space<vmem>>, %arg4: memref<64x128xbf16, #tpu.memory_space<vmem>>, %arg5: memref<1x128xf32, #tpu.memory_space<vmem>>, %arg6: memref<128x128xbf16, #tpu.memory_space<vmem>>, %arg7: memref<1x128xf32, #tpu.memory_space<vmem>>, %arg8: memref<64x192xbf16, #tpu.memory_space<vmem>>, %arg9: memref<1x192xf32, #tpu.memory_space<vmem>>, %arg10: memref<16x64xf32, #tpu.memory_space<vmem>>, %arg11: memref<16x128xf32, #tpu.memory_space<vmem>>, %arg12: memref<16x192xf32, #tpu.memory_space<vmem>>) attributes {dimension_semantics = [#tpu.dimension_semantics<parallel>], iteration_bounds = array<i64: 1>, scalar_prefetch = 0 : i64, scratch_operands = 0 : i64, tpu.core_type = #tpu.core_type<tc>, window_params = [{transform_indices = @transform_0, window_bounds = array<i64: 16, 64>}, {transform_indices = @transform_1, window_bounds = array<i64: 16, 64>}, {transform_indices = @transform_2, window_bounds = array<i64: 16, 64>}, {pipeline_mode = #tpu.pipeline_mode<synchronous>, transform_indices = @transform_3, window_bounds = array<i64: 64, 128>}, {pipeline_mode = #tpu.pipeline_mode<synchronous>, transform_indices = @transform_4, window_bounds = array<i64: 1, 128>}, {pipeline_mode = #tpu.pipeline_mode<synchronous>, transform_indices = @transform_5, window_bounds = array<i64: 128, 128>}, {pipeline_mode = #tpu.pipeline_mode<synchronous>, transform_indices = @transform_6, window_bounds = array<i64: 1, 128>}, {pipeline_mode = #tpu.pipeline_mode<synchronous>, transform_indices = @transform_7, window_bounds = array<i64: 64, 192>}, {pipeline_mode = #tpu.pipeline_mode<synchronous>, transform_indices = @transform_8, window_bounds = array<i64: 1, 192>}, {transform_indices = @transform_9, window_bounds = array<i64: 16, 64>}, {transform_indices = @transform_10, window_bounds = array<i64: 16, 128>}, {transform_indices = @transform_11, window_bounds = array<i64: 16, 192>}]} {
    %c0 = arith.constant 0 : index
    %c0_0 = arith.constant 0 : index
    %0 = vector.load %arg1[%c0, %c0_0] : memref<16x64xf32, #tpu.memory_space<vmem>>, vector<16x64xf32>
    %c0_1 = arith.constant 0 : index
    %c0_2 = arith.constant 0 : index
    %1 = vector.load %arg2[%c0_1, %c0_2] : memref<16x64xf32, #tpu.memory_space<vmem>>, vector<16x64xf32>
    %cst = arith.constant dense<0.000000e+00> : vector<16xf32>
    %2 = vector.multi_reduction <add>, %1, %cst [1] : vector<16x64xf32> to vector<16xf32>
    %3 = vector.shape_cast %2 : vector<16xf32> to vector<16x1xf32>
    %cst_3 = arith.constant 6.400000e+01 : f32
    %4 = vector.broadcast %cst_3 : f32 to vector<16x1xf32>
    %5 = arith.divf %3, %4 : vector<16x1xf32>
    %6 = vector.broadcast %5 : vector<16x1xf32> to vector<16x64xf32>
    %7 = arith.subf %1, %6 : vector<16x64xf32>
    %8 = arith.mulf %7, %7 : vector<16x64xf32>
    %cst_4 = arith.constant dense<0.000000e+00> : vector<16xf32>
    %9 = vector.multi_reduction <add>, %8, %cst_4 [1] : vector<16x64xf32> to vector<16xf32>
    %10 = vector.shape_cast %9 : vector<16xf32> to vector<16x1xf32>
    %cst_5 = arith.constant 6.400000e+01 : f32
    %11 = vector.broadcast %cst_5 : f32 to vector<16x1xf32>
    %12 = arith.divf %10, %11 : vector<16x1xf32>
    %13 = vector.broadcast %5 : vector<16x1xf32> to vector<16x64xf32>
    %14 = arith.subf %1, %13 : vector<16x64xf32>
    %cst_6 = arith.constant 9.99999974E-6 : f32
    %15 = vector.broadcast %cst_6 : f32 to vector<16x1xf32>
    %16 = arith.addf %12, %15 : vector<16x1xf32>
    %17 = math.rsqrt %16 : vector<16x1xf32>
    %18 = vector.broadcast %17 : vector<16x1xf32> to vector<16x64xf32>
    %19 = arith.mulf %14, %18 : vector<16x64xf32>
    %20 = arith.addf %0, %19 : vector<16x64xf32>
    %21 = arith.negf %20 : vector<16x64xf32>
    %22 = math.exp %21 : vector<16x64xf32>
    %cst_7 = arith.constant 1.000000e+00 : f32
    %23 = vector.broadcast %cst_7 : f32 to vector<16x64xf32>
    %24 = arith.addf %23, %22 : vector<16x64xf32>
    %25 = arith.divf %23, %24 : vector<16x64xf32>
    %26 = arith.mulf %20, %25 : vector<16x64xf32>
    %c0_8 = arith.constant 0 : index
    %c0_9 = arith.constant 0 : index
    %27 = vector.load %arg10[%c0_8, %c0_9] : memref<16x64xf32, #tpu.memory_space<vmem>>, vector<16x64xf32>
    tpu.vector_store %arg10[%c0_8, %c0_9], %26 {strides = array<i32>} : memref<16x64xf32, #tpu.memory_space<vmem>>, vector<16x64xf32>,
    %28 = arith.truncf %26 : vector<16x64xf32> to vector<16x64xbf16>
    %c0_10 = arith.constant 0 : index
    %c0_11 = arith.constant 0 : index
    %29 = vector.load %arg4[%c0_10, %c0_11] : memref<64x128xbf16, #tpu.memory_space<vmem>>, vector<64x128xbf16>
    %cst_12 = arith.constant dense<0.000000e+00> : vector<16x128xf32>
    %30 = tpu.matmul %28, %29, %cst_12 {dimension_numbers = #tpu.dot_dimension_numbers<[1], [0], [0], [1], [0, 0, 1, 1], [], []>} : vector<16x64xbf16>, vector<64x128xbf16>, vector<16x128xf32> -> vector<16x128xf32>
    %c0_13 = arith.constant 0 : index
    %c0_14 = arith.constant 0 : index
    %31 = vector.load %arg5[%c0_13, %c0_14] : memref<1x128xf32, #tpu.memory_space<vmem>>, vector<1x128xf32>
    %32 = vector.broadcast %31 : vector<1x128xf32> to vector<16x128xf32>
    %33 = arith.addf %30, %32 : vector<16x128xf32>
    %34 = vector.extract_strided_slice %33 {offsets = [0, 0], sizes = [16, 64], strides = [1, 1]} : vector<16x128xf32> to vector<16x64xf32>
    %cst_15 = arith.constant dense<0.000000e+00> : vector<16xf32>
    %35 = vector.multi_reduction <add>, %34, %cst_15 [1] : vector<16x64xf32> to vector<16xf32>
    %36 = vector.shape_cast %35 : vector<16xf32> to vector<16x1xf32>
    %cst_16 = arith.constant 6.400000e+01 : f32
    %37 = vector.broadcast %cst_16 : f32 to vector<16x1xf32>
    %38 = arith.divf %36, %37 : vector<16x1xf32>
    %39 = vector.broadcast %38 : vector<16x1xf32> to vector<16x64xf32>
    %40 = arith.subf %34, %39 : vector<16x64xf32>
    %41 = arith.mulf %40, %40 : vector<16x64xf32>
    %cst_17 = arith.constant dense<0.000000e+00> : vector<16xf32>
    %42 = vector.multi_reduction <add>, %41, %cst_17 [1] : vector<16x64xf32> to vector<16xf32>
    %43 = vector.shape_cast %42 : vector<16xf32> to vector<16x1xf32>
    %cst_18 = arith.constant 6.400000e+01 : f32
    %44 = vector.broadcast %cst_18 : f32 to vector<16x1xf32>
    %45 = arith.divf %43, %44 : vector<16x1xf32>
    %46 = vector.broadcast %38 : vector<16x1xf32> to vector<16x64xf32>
    %47 = arith.subf %34, %46 : vector<16x64xf32>
    %cst_19 = arith.constant 9.99999974E-6 : f32
    %48 = vector.broadcast %cst_19 : f32 to vector<16x1xf32>
    %49 = arith.addf %45, %48 : vector<16x1xf32>
    %50 = math.rsqrt %49 : vector<16x1xf32>
    %51 = vector.broadcast %50 : vector<16x1xf32> to vector<16x64xf32>
    %52 = arith.mulf %47, %51 : vector<16x64xf32>
    %cst_20 = arith.constant 5.000000e-01 : f32
    %53 = vector.broadcast %cst_20 : f32 to vector<16x64xf32>
    %54 = arith.mulf %53, %52 : vector<16x64xf32>
    %cst_21 = arith.constant 0.707106769 : f32
    %55 = vector.broadcast %cst_21 : f32 to vector<16x64xf32>
    %56 = arith.mulf %52, %55 : vector<16x64xf32>
    %cst_22 = arith.constant 0.000000e+00 : f32
    %57 = vector.broadcast %cst_22 : f32 to vector<16x64xf32>
    %58 = arith.cmpf oge, %56, %57 : vector<16x64xf32>
    %cst_23 = arith.constant 1.000000e+00 : f32
    %cst_24 = arith.constant -1.000000e+00 : f32
    %59 = vector.broadcast %cst_23 : f32 to vector<16x64xf32>
    %60 = vector.broadcast %cst_24 : f32 to vector<16x64xf32>
    %61 = arith.select %58, %59, %60 : vector<16x64xi1>, vector<16x64xf32>
    %62 = math.absf %56 : vector<16x64xf32>
    %cst_25 = arith.constant 0.327591091 : f32
    %63 = vector.broadcast %cst_25 : f32 to vector<16x64xf32>
    %64 = arith.mulf %63, %62 : vector<16x64xf32>
    %cst_26 = arith.constant 1.000000e+00 : f32
    %65 = vector.broadcast %cst_26 : f32 to vector<16x64xf32>
    %66 = arith.addf %65, %64 : vector<16x64xf32>
    %cst_27 = arith.constant 1.000000e+00 : f32
    %67 = vector.broadcast %cst_27 : f32 to vector<16x64xf32>
    %68 = arith.divf %67, %66 : vector<16x64xf32>
    %cst_28 = arith.constant 1.06140542 : f32
    %69 = vector.broadcast %cst_28 : f32 to vector<16x64xf32>
    %70 = arith.mulf %69, %68 : vector<16x64xf32>
    %cst_29 = arith.constant -1.45315206 : f32
    %71 = vector.broadcast %cst_29 : f32 to vector<16x64xf32>
    %72 = arith.addf %70, %71 : vector<16x64xf32>
    %73 = arith.mulf %72, %68 : vector<16x64xf32>
    %cst_30 = arith.constant 1.42141378 : f32
    %74 = vector.broadcast %cst_30 : f32 to vector<16x64xf32>
    %75 = arith.addf %73, %74 : vector<16x64xf32>
    %76 = arith.mulf %75, %68 : vector<16x64xf32>
    %cst_31 = arith.constant -0.284496725 : f32
    %77 = vector.broadcast %cst_31 : f32 to vector<16x64xf32>
    %78 = arith.addf %76, %77 : vector<16x64xf32>
    %79 = arith.mulf %78, %68 : vector<16x64xf32>
    %cst_32 = arith.constant 0.254829586 : f32
    %80 = vector.broadcast %cst_32 : f32 to vector<16x64xf32>
    %81 = arith.addf %79, %80 : vector<16x64xf32>
    %82 = arith.mulf %81, %68 : vector<16x64xf32>
    %cst_33 = arith.constant 0.000000e+00 : f32
    %83 = vector.broadcast %cst_33 : f32 to vector<16x64xf32>
    %84 = arith.subf %83, %62 : vector<16x64xf32>
    %85 = arith.mulf %84, %62 : vector<16x64xf32>
    %86 = math.exp %85 : vector<16x64xf32>
    %87 = arith.mulf %82, %86 : vector<16x64xf32>
    %cst_34 = arith.constant 1.000000e+00 : f32
    %88 = vector.broadcast %cst_34 : f32 to vector<16x64xf32>
    %89 = arith.subf %88, %87 : vector<16x64xf32>
    %90 = arith.mulf %61, %89 : vector<16x64xf32>
    %cst_35 = arith.constant 1.000000e+00 : f32
    %91 = vector.broadcast %cst_35 : f32 to vector<16x64xf32>
    %92 = arith.addf %91, %90 : vector<16x64xf32>
    %93 = arith.mulf %54, %92 : vector<16x64xf32>
    %94 = vector.extract_strided_slice %33 {offsets = [0, 64], sizes = [16, 64], strides = [1, 1]} : vector<16x128xf32> to vector<16x64xf32>
    %cst_36 = arith.constant dense<0.000000e+00> : vector<16xf32>
    %95 = vector.multi_reduction <add>, %94, %cst_36 [1] : vector<16x64xf32> to vector<16xf32>
    %96 = vector.shape_cast %95 : vector<16xf32> to vector<16x1xf32>
    %cst_37 = arith.constant 6.400000e+01 : f32
    %97 = vector.broadcast %cst_37 : f32 to vector<16x1xf32>
    %98 = arith.divf %96, %97 : vector<16x1xf32>
    %99 = vector.broadcast %98 : vector<16x1xf32> to vector<16x64xf32>
    %100 = arith.subf %94, %99 : vector<16x64xf32>
    %101 = arith.mulf %100, %100 : vector<16x64xf32>
    %cst_38 = arith.constant dense<0.000000e+00> : vector<16xf32>
    %102 = vector.multi_reduction <add>, %101, %cst_38 [1] : vector<16x64xf32> to vector<16xf32>
    %103 = vector.shape_cast %102 : vector<16xf32> to vector<16x1xf32>
    %cst_39 = arith.constant 6.400000e+01 : f32
    %104 = vector.broadcast %cst_39 : f32 to vector<16x1xf32>
    %105 = arith.divf %103, %104 : vector<16x1xf32>
    %106 = vector.broadcast %98 : vector<16x1xf32> to vector<16x64xf32>
    %107 = arith.subf %94, %106 : vector<16x64xf32>
    %cst_40 = arith.constant 9.99999974E-6 : f32
    %108 = vector.broadcast %cst_40 : f32 to vector<16x1xf32>
    %109 = arith.addf %105, %108 : vector<16x1xf32>
    %110 = math.rsqrt %109 : vector<16x1xf32>
    %111 = vector.broadcast %110 : vector<16x1xf32> to vector<16x64xf32>
    %112 = arith.mulf %107, %111 : vector<16x64xf32>
    %cst_41 = arith.constant 5.000000e-01 : f32
    %113 = vector.broadcast %cst_41 : f32 to vector<16x64xf32>
    %114 = arith.mulf %113, %112 : vector<16x64xf32>
    %cst_42 = arith.constant 0.707106769 : f32
    %115 = vector.broadcast %cst_42 : f32 to vector<16x64xf32>
    %116 = arith.mulf %112, %115 : vector<16x64xf32>
    %cst_43 = arith.constant 0.000000e+00 : f32
    %117 = vector.broadcast %cst_43 : f32 to vector<16x64xf32>
    %118 = arith.cmpf oge, %116, %117 : vector<16x64xf32>
    %cst_44 = arith.constant 1.000000e+00 : f32
    %cst_45 = arith.constant -1.000000e+00 : f32
    %119 = vector.broadcast %cst_44 : f32 to vector<16x64xf32>
    %120 = vector.broadcast %cst_45 : f32 to vector<16x64xf32>
    %121 = arith.select %118, %119, %120 : vector<16x64xi1>, vector<16x64xf32>
    %122 = math.absf %116 : vector<16x64xf32>
    %cst_46 = arith.constant 0.327591091 : f32
    %123 = vector.broadcast %cst_46 : f32 to vector<16x64xf32>
    %124 = arith.mulf %123, %122 : vector<16x64xf32>
    %cst_47 = arith.constant 1.000000e+00 : f32
    %125 = vector.broadcast %cst_47 : f32 to vector<16x64xf32>
    %126 = arith.addf %125, %124 : vector<16x64xf32>
    %cst_48 = arith.constant 1.000000e+00 : f32
    %127 = vector.broadcast %cst_48 : f32 to vector<16x64xf32>
    %128 = arith.divf %127, %126 : vector<16x64xf32>
    %cst_49 = arith.constant 1.06140542 : f32
    %129 = vector.broadcast %cst_49 : f32 to vector<16x64xf32>
    %130 = arith.mulf %129, %128 : vector<16x64xf32>
    %cst_50 = arith.constant -1.45315206 : f32
    %131 = vector.broadcast %cst_50 : f32 to vector<16x64xf32>
    %132 = arith.addf %130, %131 : vector<16x64xf32>
    %133 = arith.mulf %132, %128 : vector<16x64xf32>
    %cst_51 = arith.constant 1.42141378 : f32
    %134 = vector.broadcast %cst_51 : f32 to vector<16x64xf32>
    %135 = arith.addf %133, %134 : vector<16x64xf32>
    %136 = arith.mulf %135, %128 : vector<16x64xf32>
    %cst_52 = arith.constant -0.284496725 : f32
    %137 = vector.broadcast %cst_52 : f32 to vector<16x64xf32>
    %138 = arith.addf %136, %137 : vector<16x64xf32>
    %139 = arith.mulf %138, %128 : vector<16x64xf32>
    %cst_53 = arith.constant 0.254829586 : f32
    %140 = vector.broadcast %cst_53 : f32 to vector<16x64xf32>
    %141 = arith.addf %139, %140 : vector<16x64xf32>
    %142 = arith.mulf %141, %128 : vector<16x64xf32>
    %cst_54 = arith.constant 0.000000e+00 : f32
    %143 = vector.broadcast %cst_54 : f32 to vector<16x64xf32>
    %144 = arith.subf %143, %122 : vector<16x64xf32>
    %145 = arith.mulf %144, %122 : vector<16x64xf32>
    %146 = math.exp %145 : vector<16x64xf32>
    %147 = arith.mulf %142, %146 : vector<16x64xf32>
    %cst_55 = arith.constant 1.000000e+00 : f32
    %148 = vector.broadcast %cst_55 : f32 to vector<16x64xf32>
    %149 = arith.subf %148, %147 : vector<16x64xf32>
    %150 = arith.mulf %121, %149 : vector<16x64xf32>
    %cst_56 = arith.constant 1.000000e+00 : f32
    %151 = vector.broadcast %cst_56 : f32 to vector<16x64xf32>
    %152 = arith.addf %151, %150 : vector<16x64xf32>
    %153 = arith.mulf %114, %152 : vector<16x64xf32>
    %154 = tpu.concatenate %93, %153 in 1 : vector<16x64xf32>, vector<16x64xf32> -> vector<16x128xf32>
    %155 = arith.truncf %154 : vector<16x128xf32> to vector<16x128xbf16>
    %c0_57 = arith.constant 0 : index
    %c0_58 = arith.constant 0 : index
    %156 = vector.load %arg6[%c0_57, %c0_58] : memref<128x128xbf16, #tpu.memory_space<vmem>>, vector<128x128xbf16>
    %cst_59 = arith.constant dense<0.000000e+00> : vector<16x128xf32>
    %157 = tpu.matmul %155, %156, %cst_59 {dimension_numbers = #tpu.dot_dimension_numbers<[1], [0], [0], [1], [0, 0, 1, 1], [], []>} : vector<16x128xbf16>, vector<128x128xbf16>, vector<16x128xf32> -> vector<16x128xf32>
    %c0_60 = arith.constant 0 : index
    %c0_61 = arith.constant 0 : index
    %158 = vector.load %arg7[%c0_60, %c0_61] : memref<1x128xf32, #tpu.memory_space<vmem>>, vector<1x128xf32>
    %159 = vector.broadcast %158 : vector<1x128xf32> to vector<16x128xf32>
    %160 = arith.addf %157, %159 : vector<16x128xf32>
    %161 = vector.extract_strided_slice %160 {offsets = [0, 0], sizes = [16, 64], strides = [1, 1]} : vector<16x128xf32> to vector<16x64xf32>
    %162 = vector.extract_strided_slice %160 {offsets = [0, 64], sizes = [16, 64], strides = [1, 1]} : vector<16x128xf32> to vector<16x64xf32>
    %cst_62 = arith.constant 5.000000e-01 : f32
    %163 = vector.broadcast %cst_62 : f32 to vector<16x64xf32>
    %164 = arith.mulf %163, %162 : vector<16x64xf32>
    %165 = math.exp %164 : vector<16x64xf32>
    %cst_63 = arith.constant 9.99999974E-6 : f32
    %166 = vector.broadcast %cst_63 : f32 to vector<16x64xf32>
    %167 = arith.addf %165, %166 : vector<16x64xf32>
    %c0_64 = arith.constant 0 : index
    %c0_65 = arith.constant 0 : index
    %168 = vector.load %arg3[%c0_64, %c0_65] : memref<16x64xf32, #tpu.memory_space<vmem>>, vector<16x64xf32>
    %169 = arith.mulf %167, %168 : vector<16x64xf32>
    %170 = arith.addf %161, %169 : vector<16x64xf32>
    %171 = tpu.concatenate %161, %170 in 1 : vector<16x64xf32>, vector<16x64xf32> -> vector<16x128xf32>
    %c0_66 = arith.constant 0 : index
    %c0_67 = arith.constant 0 : index
    %172 = vector.load %arg11[%c0_66, %c0_67] : memref<16x128xf32, #tpu.memory_space<vmem>>, vector<16x128xf32>
    tpu.vector_store %arg11[%c0_66, %c0_67], %171 {strides = array<i32>} : memref<16x128xf32, #tpu.memory_space<vmem>>, vector<16x128xf32>,
    %173 = arith.truncf %170 : vector<16x64xf32> to vector<16x64xbf16>
    %c0_68 = arith.constant 0 : index
    %c0_69 = arith.constant 0 : index
    %174 = vector.load %arg8[%c0_68, %c0_69] : memref<64x192xbf16, #tpu.memory_space<vmem>>, vector<64x192xbf16>
    %cst_70 = arith.constant dense<0.000000e+00> : vector<16x192xf32>
    %175 = tpu.matmul %173, %174, %cst_70 {dimension_numbers = #tpu.dot_dimension_numbers<[1], [0], [0], [1], [0, 0, 1, 1], [], []>} : vector<16x64xbf16>, vector<64x192xbf16>, vector<16x192xf32> -> vector<16x192xf32>
    %c0_71 = arith.constant 0 : index
    %c0_72 = arith.constant 0 : index
    %176 = vector.load %arg9[%c0_71, %c0_72] : memref<1x192xf32, #tpu.memory_space<vmem>>, vector<1x192xf32>
    %177 = vector.broadcast %176 : vector<1x192xf32> to vector<16x192xf32>
    %178 = arith.addf %175, %177 : vector<16x192xf32>
    %c0_73 = arith.constant 0 : index
    %c0_74 = arith.constant 0 : index
    %179 = vector.load %arg12[%c0_73, %c0_74] : memref<16x192xf32, #tpu.memory_space<vmem>>, vector<16x192xf32>
    tpu.vector_store %arg12[%c0_73, %c0_74], %178 {strides = array<i32>} : memref<16x192xf32, #tpu.memory_space<vmem>>, vector<16x192xf32>,
    return
  }
  func.func @transform_0(%arg0: i32) -> (i32, i32) {
    %c0_i32 = arith.constant 0 : i32
    %c0_i32_0 = arith.constant 0 : i32
    return %arg0, %c0_i32 : i32, i32
  }
  func.func @transform_1(%arg0: i32) -> (i32, i32) {
    %c0_i32 = arith.constant 0 : i32
    %c0_i32_0 = arith.constant 0 : i32
    return %arg0, %c0_i32 : i32, i32
  }
  func.func @transform_2(%arg0: i32) -> (i32, i32) {
    %c0_i32 = arith.constant 0 : i32
    %c0_i32_0 = arith.constant 0 : i32
    return %arg0, %c0_i32 : i32, i32
  }
  func.func @transform_3(%arg0: i32) -> (i32, i32) {
    %c0_i32 = arith.constant 0 : i32
    %c0_i32_0 = arith.constant 0 : i32
    %c0_i32_1 = arith.constant 0 : i32
    return %c0_i32, %c0_i32_0 : i32, i32
  }
  func.func @transform_4(%arg0: i32) -> (i32, i32) {
    %c0_i32 = arith.constant 0 : i32
    %c0_i32_0 = arith.constant 0 : i32
    %c0_i32_1 = arith.constant 0 : i32
    return %c0_i32, %c0_i32_0 : i32, i32
  }
  func.func @transform_5(%arg0: i32) -> (i32, i32) {
    %c0_i32 = arith.constant 0 : i32
    %c0_i32_0 = arith.constant 0 : i32
    %c0_i32_1 = arith.constant 0 : i32
    return %c0_i32, %c0_i32_0 : i32, i32
  }
  func.func @transform_6(%arg0: i32) -> (i32, i32) {
    %c0_i32 = arith.constant 0 : i32
    %c0_i32_0 = arith.constant 0 : i32
    %c0_i32_1 = arith.constant 0 : i32
    return %c0_i32, %c0_i32_0 : i32, i32
  }
  func.func @transform_7(%arg0: i32) -> (i32, i32) {
    %c0_i32 = arith.constant 0 : i32
    %c0_i32_0 = arith.constant 0 : i32
    %c0_i32_1 = arith.constant 0 : i32
    return %c0_i32, %c0_i32_0 : i32, i32
  }
  func.func @transform_8(%arg0: i32) -> (i32, i32) {
    %c0_i32 = arith.constant 0 : i32
    %c0_i32_0 = arith.constant 0 : i32
    %c0_i32_1 = arith.constant 0 : i32
    return %c0_i32, %c0_i32_0 : i32, i32
  }
  func.func @transform_9(%arg0: i32) -> (i32, i32) {
    %c0_i32 = arith.constant 0 : i32
    %c0_i32_0 = arith.constant 0 : i32
    return %arg0, %c0_i32 : i32, i32
  }
  func.func @transform_10(%arg0: i32) -> (i32, i32) {
    %c0_i32 = arith.constant 0 : i32
    %c0_i32_0 = arith.constant 0 : i32
    return %arg0, %c0_i32 : i32, i32
  }
  func.func @transform_11(%arg0: i32) -> (i32, i32) {
    %c0_i32 = arith.constant 0 : i32
    %c0_i32_0 = arith.constant 0 : i32
    return %arg0, %c0_i32 : i32, i32
  }
}

module attributes {stable_mosaic.version = 11 : i64} {
  func.func @out_fc_kernel(%arg0: i32, %arg1: memref<16x64xf32, #tpu.memory_space<vmem>>, %arg2: memref<16x64xf32, #tpu.memory_space<vmem>>, %arg3: memref<64x128xbf16, #tpu.memory_space<vmem>>, %arg4: memref<1x128xf32, #tpu.memory_space<vmem>>, %arg5: memref<16x128xf32, #tpu.memory_space<vmem>>) attributes {dimension_semantics = [#tpu.dimension_semantics<parallel>], iteration_bounds = array<i64: 1>, scalar_prefetch = 0 : i64, scratch_operands = 0 : i64, tpu.core_type = #tpu.core_type<tc>, window_params = [{transform_indices = @transform_0, window_bounds = array<i64: 16, 64>}, {transform_indices = @transform_1, window_bounds = array<i64: 16, 64>}, {pipeline_mode = #tpu.pipeline_mode<synchronous>, transform_indices = @transform_2, window_bounds = array<i64: 64, 128>}, {pipeline_mode = #tpu.pipeline_mode<synchronous>, transform_indices = @transform_3, window_bounds = array<i64: 1, 128>}, {transform_indices = @transform_4, window_bounds = array<i64: 16, 128>}]} {
    %c0 = arith.constant 0 : index
    %c0_0 = arith.constant 0 : index
    %0 = vector.load %arg1[%c0, %c0_0] : memref<16x64xf32, #tpu.memory_space<vmem>>, vector<16x64xf32>
    %c0_1 = arith.constant 0 : index
    %c0_2 = arith.constant 0 : index
    %1 = vector.load %arg2[%c0_1, %c0_2] : memref<16x64xf32, #tpu.memory_space<vmem>>, vector<16x64xf32>
    %cst = arith.constant dense<0.000000e+00> : vector<16xf32>
    %2 = vector.multi_reduction <add>, %1, %cst [1] : vector<16x64xf32> to vector<16xf32>
    %3 = vector.shape_cast %2 : vector<16xf32> to vector<16x1xf32>
    %cst_3 = arith.constant 6.400000e+01 : f32
    %4 = vector.broadcast %cst_3 : f32 to vector<16x1xf32>
    %5 = arith.divf %3, %4 : vector<16x1xf32>
    %6 = vector.broadcast %5 : vector<16x1xf32> to vector<16x64xf32>
    %7 = arith.subf %1, %6 : vector<16x64xf32>
    %8 = arith.mulf %7, %7 : vector<16x64xf32>
    %cst_4 = arith.constant dense<0.000000e+00> : vector<16xf32>
    %9 = vector.multi_reduction <add>, %8, %cst_4 [1] : vector<16x64xf32> to vector<16xf32>
    %10 = vector.shape_cast %9 : vector<16xf32> to vector<16x1xf32>
    %cst_5 = arith.constant 6.400000e+01 : f32
    %11 = vector.broadcast %cst_5 : f32 to vector<16x1xf32>
    %12 = arith.divf %10, %11 : vector<16x1xf32>
    %13 = vector.broadcast %5 : vector<16x1xf32> to vector<16x64xf32>
    %14 = arith.subf %1, %13 : vector<16x64xf32>
    %cst_6 = arith.constant 9.99999974E-6 : f32
    %15 = vector.broadcast %cst_6 : f32 to vector<16x1xf32>
    %16 = arith.addf %12, %15 : vector<16x1xf32>
    %17 = math.rsqrt %16 : vector<16x1xf32>
    %18 = vector.broadcast %17 : vector<16x1xf32> to vector<16x64xf32>
    %19 = arith.mulf %14, %18 : vector<16x64xf32>
    %20 = arith.addf %0, %19 : vector<16x64xf32>
    %21 = arith.negf %20 : vector<16x64xf32>
    %22 = math.exp %21 : vector<16x64xf32>
    %cst_7 = arith.constant 1.000000e+00 : f32
    %23 = vector.broadcast %cst_7 : f32 to vector<16x64xf32>
    %24 = arith.addf %23, %22 : vector<16x64xf32>
    %25 = arith.divf %23, %24 : vector<16x64xf32>
    %26 = arith.mulf %20, %25 : vector<16x64xf32>
    %27 = arith.truncf %26 : vector<16x64xf32> to vector<16x64xbf16>
    %c0_8 = arith.constant 0 : index
    %c0_9 = arith.constant 0 : index
    %28 = vector.load %arg3[%c0_8, %c0_9] : memref<64x128xbf16, #tpu.memory_space<vmem>>, vector<64x128xbf16>
    %cst_10 = arith.constant dense<0.000000e+00> : vector<16x128xf32>
    %29 = tpu.matmul %27, %28, %cst_10 {dimension_numbers = #tpu.dot_dimension_numbers<[1], [0], [0], [1], [0, 0, 1, 1], [], []>} : vector<16x64xbf16>, vector<64x128xbf16>, vector<16x128xf32> -> vector<16x128xf32>
    %c0_11 = arith.constant 0 : index
    %c0_12 = arith.constant 0 : index
    %30 = vector.load %arg4[%c0_11, %c0_12] : memref<1x128xf32, #tpu.memory_space<vmem>>, vector<1x128xf32>
    %31 = vector.broadcast %30 : vector<1x128xf32> to vector<16x128xf32>
    %32 = arith.addf %29, %31 : vector<16x128xf32>
    %c0_13 = arith.constant 0 : index
    %c0_14 = arith.constant 0 : index
    %33 = vector.load %arg5[%c0_13, %c0_14] : memref<16x128xf32, #tpu.memory_space<vmem>>, vector<16x128xf32>
    tpu.vector_store %arg5[%c0_13, %c0_14], %32 {strides = array<i32>} : memref<16x128xf32, #tpu.memory_space<vmem>>, vector<16x128xf32>,
    return
  }
  func.func @transform_0(%arg0: i32) -> (i32, i32) {
    %c0_i32 = arith.constant 0 : i32
    %c0_i32_0 = arith.constant 0 : i32
    return %arg0, %c0_i32 : i32, i32
  }
  func.func @transform_1(%arg0: i32) -> (i32, i32) {
    %c0_i32 = arith.constant 0 : i32
    %c0_i32_0 = arith.constant 0 : i32
    return %arg0, %c0_i32 : i32, i32
  }
  func.func @transform_2(%arg0: i32) -> (i32, i32) {
    %c0_i32 = arith.constant 0 : i32
    %c0_i32_0 = arith.constant 0 : i32
    %c0_i32_1 = arith.constant 0 : i32
    return %c0_i32, %c0_i32_0 : i32, i32
  }
  func.func @transform_3(%arg0: i32) -> (i32, i32) {
    %c0_i32 = arith.constant 0 : i32
    %c0_i32_0 = arith.constant 0 : i32
    %c0_i32_1 = arith.constant 0 : i32
    return %c0_i32, %c0_i32_0 : i32, i32
  }
  func.func @transform_4(%arg0: i32) -> (i32, i32) {
    %c0_i32 = arith.constant 0 : i32
    %c0_i32_0 = arith.constant 0 : i32
    return %arg0, %c0_i32 : i32, i32
  }
}

</mosaic_0001>

<bundles_post_ra>
// kernel: vgru_ed_forward.6
= control target key start
LH: loop header
LB: loop body
LE: loop exit
PB: predicated region body
PF: predicated region fallthrough
CT: control target
= control target key end

     0   :  { %s463_s15 = smov 0   ;;  %s519_s0 = inlined_call_operand.vmem [shape: f32[8,2,192], index: 0, kind: input, shape index: {}]   ;;  %s520_s1 = inlined_call_operand.vmem [shape: f32[2,64], index: 1, kind: input, shape index: {}]   ;;  %s521_s2 = inlined_call_operand.vmem [shape: bf16[64,192], index: 2, kind: input, shape index: {}]   ;;  %s522_s3 = inlined_call_operand.vmem [shape: f32[1,192], index: 3, kind: input, shape index: {}]   ;;  %s523_s4 = inlined_call_operand.vmem [shape: f32[8,2,64], index: 4, kind: output, shape index: {}]  }
   0x1 LB: > { %s469_s16 = sadd.s32 4294967295, %s433_s15   ;;  %p380_p0 = scmp.ge.s32.totalorder %s433_s15, 1  ;;  %s433_s15 = sphi %s463_s15, %s14_s15  }
   0x2   : > { %p157_p1 = scmp.lt.s32.totalorder %s433_s15, 9 }
   0x4   : > { %p158_p2 = pnand %p380_p0, %p157_p1 }
   0x5   : > { %p178_p3 = scmp.lt.s32.totalorder (!%p158_p2), %s469_s16, 7  ;;  %p383_p4 = scmp.ne.s32.totalorder (!%p158_p2), %s469_s16, 0 }
   0x6   : > { %161 = sbr.rel (%p158_p2) target bundleno = 524 (0x20c), region = 36 }
   0xb   : > { %s179_s17 = scalar_select %p178_p3, %s469_s16, 7 }
   0xc   : > { %187 = sbr.rel (%p383_p4) target bundleno = 19 (0x13), region = 40 }
   0xd   : > { %s397_s18 = sshll.u32 %s179_s17, 2 }
   0xe   : > { %s478_s21 = scalar_lea.vmem %s519_s0, %s397_s18 }
  0x11   : > { %v188_v0 = vld [vmem:[%s520_s1] sm:$0x3]  ;;  %vm189_vm0 = vcmask 517120  }
  0x12   : > { %190 = vst.msk [vmem:[#allocation2] sm:$0x3] %vm189_vm0, %v188_v0 }
  0x13 PF: > { %v409_v1 = vld [vmem:[%s521_s2 + $0x34] ss:$8 sps:$4 sm:$0xff]   ;;  %v411_v2 = vld [vmem:[%s521_s2 + $0x30] ss:$8 sps:$4 sm:$0xff]   ;;  %v435_v3 = vmov 0   ;;  %vm254_vm1 = vcmask 523264   ;;  %v204_v12 = vlaneseq }
  0x14   : > { %290 = vmatprep.mubr.bf16.mxu0 %v435_v3  ;;  %266 = vmatprep.subr.bf16.mxu0 %v409_v1  ;;  %v412_v4 = vld [vmem:[%s521_s2 + $0x24] ss:$8 sps:$4 sm:$0xff]   ;;  %v414_v5 = vld [vmem:[%s521_s2 + $0x20] ss:$8 sps:$4 sm:$0xff]   ;;  %v415_v6 = vld [vmem:[%s521_s2 + $0x14] ss:$8 sps:$4 sm:$0xff]  }
  0x15   : > { %267 = vmatpush1.bf16.msra.mxu0 %v411_v2  ;;  %v417_v7 = vld [vmem:[%s521_s2 + $0x10] ss:$8 sps:$4 sm:$0xff]   ;;  %v418_v8 = vld [vmem:[%s521_s2 + $0x4] ss:$8 sps:$4 sm:$0xff]   ;;  %v420_v9 = vld [vmem:[%s521_s2] ss:$8 sps:$4 sm:$0xff]  }
  0x16   : > { %268 = vmatprep.subr.bf16.mxu0 %v412_v4  ;;  %v205_v13 = vshrl.u32 %v204_v12, 7  ;;  %v202_v15 = vld [vmem:[%s522_s3] sm:$0x3]  ;;  %v436_v34 = vmov 1983009808   ;;  %s437_s18 = smov 64  }
  0x17   : > { %v192_v17 = vld [vmem:[%s478_s21] sm:$0xf]  ;;  %v320_v35 = vunpack.c.l.s4 %v436_v34  ;;  %s394_s19 = sshll.u32 %s469_s16, 1  ;;  %vm342_vm2 = vcmask 517120  }
  0x18   : > { %v206_v14 = vsub.s32 0, %v205_v13  ;;  %v210_v27 = vsub.s32 1, %v205_v13  ;;  %v308_v29 = vrot.slane %v192_v17, 2  ;;  %s345_s22 = scalar_lea.vmem %s523_s4, %s394_s19 }
  0x19   : > { %269 = vmatpush1.bf16.msra.mxu0 %v414_v5  ;;  %v191_v10 = vld [vmem:[#allocation2] sm:$0x3]  ;;  %v321_v36 = vunpack.c.0.s8 %v320_v35 }
  0x1a   : > { %270 = vmatprep.subr.bf16.mxu0 %v415_v6  ;;  %v193_v11 = vpack.c.bf16 %v191_v10, %v191_v10  ;;  %v207_v16 = vrot.slane %v202_v15, %v206_v14  ;;  %v211_v28 = vrot.slane %v202_v15, %v210_v27 }
  0x1b   : > { %v324_v37 = vsub.s32 %v321_v36, %v205_v13 }
  0x1d   : > { %271 = vmatpush1.bf16.msra.mxu0 %v417_v7  ;;  %v325_v39 = vrot.slane %v191_v10, %v324_v37 }
  0x1e   : > { %272 = vmatprep.subr.bf16.mxu0 %v418_v8 }
  0x21   : > { %273 = vmatpush1.bf16.msra.mxu0 %v420_v9 }
  0x24   : > { %392 = vmatmul.mubr.msk.bf16.vlgmr.msra.gmra.mxu0 %vm254_vm1, %v193_v11 }
  0xe4   : > { %v292_v18 = vpop.f32.mrf.mxu0 }
  0xe5   : > { %v293_v19 = vadd.f32 %v292_v18, %v207_v16 }
  0xe6   : > { %v294_v20 = vpop.f32.mrf.mxu0 }
  0xe7   : > { %v299_v21 = vadd.f32 %v293_v19, %v192_v17  ;;  %v295_v30 = vadd.f32 %v294_v20, %v211_v28 }
  0xe8   : > { %v296_v22 = vpop.f32.mrf.mxu0 }
  0xe9   : > { %v393_v23 = vmul.f32 -1.442695, %v299_v21 }
  0xea   : > { %v297_v24 = vpop.f32.mrf.mxu0 }
  0xeb   : > { %421 = vpow2.f32 %v393_v23 }
  0xf8   : > { %v422_v25 = vpop.eup %421 }
  0xf9   : > { %v303_v26 = vadd.f32 1.0, %v422_v25 }
  0xfb   : > { %423 = vrcp.f32 %v303_v26 }
 0x108   : > { %v424_v31 = vpop.eup %423 }
 0x109   : > { %v306_v32 = vmul.f32 %v424_v31, %v295_v30  ;;  %v312_v41 = vsub.f32 1.0, %v424_v31 }
 0x10b   : > { %v310_v33 = vadd.f32 %v308_v29, %v306_v32 }
 0x10d   : > { %425 = vtanh.f32 %v310_v33 }
 0x11a   : > { %v426_v38 = vpop.eup %425 }
 0x11b   : > { %314 = vrot.lane.b32.xlu0 %v426_v38, %s437_s18 }
 0x11f   : > { %326 = vrot.lane.b32.xlu0 %v325_v39, %s437_s18 }
 0x18d   : > { %v315_v40 = vpop.permute.xlu0 %314 }
 0x18e   : > { %v317_v43 = vmul.f32 %v315_v40, %v312_v41 }
 0x191   : > { %v327_v42 = vpop.permute.xlu0 %326 }
 0x192   : > { %v329_v44 = vmul.f32 %v424_v31, %v327_v42 }
 0x194   : > { %v330_v45 = vadd.f32 %v329_v44, %v317_v43 }
 0x196   : > { %v338_v46 = vrot.slane %v330_v45, %v324_v37 }
 0x198   : > { %339 = vrot.lane.b32.xlu1 %v338_v46, %s437_s18 }
 0x20a   : > { %v340_v47 = vpop.permute.xlu1 %339 }
 0x20b   : > { %343 = vst.msk [vmem:[#allocation2] sm:$0x3] %vm342_vm2, %v340_v47  ;;  %346 = vst.msk [vmem:[%s345_s22] sm:$0x3] %vm342_vm2, %v340_v47 }
 0x20c PF: > { %s14_s15 = sadd.s32 1, %s433_s15  }
 0x20d   : > { %p11_p5 = scmp.ge.s32.totalorder %s14_s15, 10  }
 0x20f   :  { %13 = sbr.rel (!%p11_p5) target bundleno = 1 (0x1), region = 67 }

// kernel: vgru_ed_forward.5
= control target key start
LH: loop header
LB: loop body
LE: loop exit
PB: predicated region body
PF: predicated region fallthrough
CT: control target
= control target key end

     0   :  { %vm38_vm0 = vcmask 1041408   ;;  %v270_v0 = vmov 0.0   ;;  %vm271_vm1 = vmmov 0   ;;  %vm34_vm2 = vcmask 31744   ;;  %s374_s1 = inlined_call_operand.vmem [shape: bf16[4,64], index: 1, kind: input, shape index: {}]   ;;  %s375_s0 = inlined_call_operand.vmem [shape: f32[16,4], index: 0, kind: input, shape index: {}]   ;;  %s376_s2 = inlined_call_operand.vmem [shape: f32[1,64], index: 2, kind: input, shape index: {}]   ;;  %s377_s3 = inlined_call_operand.vmem [shape: bf16[64,192], index: 3, kind: input, shape index: {}]   ;;  %s378_s5 = inlined_call_operand.vmem [shape: f32[16,64], index: 5, kind: output, shape index: {0}]   ;;  %s379_s4 = inlined_call_operand.vmem [shape: f32[1,192], index: 4, kind: input, shape index: {}]   ;;  %s380_s6 = inlined_call_operand.vmem [shape: f32[16,192], index: 6, kind: output, shape index: {1}]  }
   0x1   :  { %245 = vmatprep.subr.bf16.mxu0 %v270_v0  ;;  %v26_v1 = vld [vmem:[%s374_s1] sm:$0x3]  ;;  %247 = vmatprep.mubr.msk.bf16.mxu0 %vm271_vm1, %v270_v0  ;;  %v24_v3 = vld [vmem:[%s375_s0 + $0x8] sm:$0xff]  ;;  %vm83_vm3 = vcmask 523264   ;;  %v254_v25 = vld [vmem:[%s377_s3 + $0x34] ss:$8 sps:$4 sm:$0xff]   ;;  %v124_v45 = vlaneseq }
   0x2   :  { %v23_v2 = vld [vmem:[%s375_s0] sm:$0xff]  ;;  %v40_v4 = vsel %vm38_vm0, %v26_v1, 0  ;;  %v256_v26 = vld [vmem:[%s377_s3 + $0x30] ss:$8 sps:$4 sm:$0xff]   ;;  %v272_v27 = vmov 0   ;;  %185 = vmatprep.subr.bf16.mxu1 %v254_v25 }
   0x3   :  { %v25_v5 = vpack.c.bf16 %v24_v3, %v23_v2  ;;  %246 = vmatpush3.bf16.msra.mxu0 %v40_v4  ;;  %v232_v6 = vld [vmem:[%s376_s2] ss:$0 sm:$0xff]  ;;  %209 = vmatprep.mubr.bf16.mxu1 %v272_v27  ;;  %v257_v28 = vld [vmem:[%s377_s3 + $0x24] ss:$8 sps:$4 sm:$0xff]   ;;  %v260_v30 = vld [vmem:[%s377_s3 + $0x14] ss:$8 sps:$4 sm:$0xff]  }
   0x4   :  { %186 = vmatpush1.bf16.msra.mxu1 %v256_v26  ;;  %v259_v29 = vld [vmem:[%s377_s3 + $0x20] ss:$8 sps:$4 sm:$0xff]   ;;  %v262_v31 = vld [vmem:[%s377_s3 + $0x10] ss:$8 sps:$4 sm:$0xff]   ;;  %v263_v32 = vld [vmem:[%s377_s3 + $0x4] ss:$8 sps:$4 sm:$0xff]  }
   0x5   :  { %187 = vmatprep.subr.bf16.mxu1 %v257_v28  ;;  %v265_v33 = vld [vmem:[%s377_s3] ss:$8 sps:$4 sm:$0xff]   ;;  %v125_v46 = vshrl.u32 %v124_v45, 7 }
   0x6   :  { %248 = vmatmul.mubr.msk.bf16.vlgmr.msra.gmra.mxu0 %vm34_vm2, %v25_v5  ;;  %v122_v48 = vld [vmem:[%s379_s4] sm:$0x3] }
   0x7   :  { %v126_v47 = vsub.s32 0, %v125_v46  ;;  %v130_v49 = vsub.s32 1, %v125_v46 }
   0x8   :  { %188 = vmatpush1.bf16.msra.mxu1 %v259_v29 }
   0x9   :  { %189 = vmatprep.subr.bf16.mxu1 %v260_v30  ;;  %v127_v50 = vrot.slane %v122_v48, %v126_v47  ;;  %v131_v51 = vrot.slane %v122_v48, %v130_v49 }
   0xc   :  { %190 = vmatpush1.bf16.msra.mxu1 %v262_v31 }
   0xd   :  { %191 = vmatprep.subr.bf16.mxu1 %v263_v32 }
  0x10   :  { %192 = vmatpush1.bf16.msra.mxu1 %v265_v33 }
  0xc6   :  { %v76_v7 = vpop.f32.mrf.mxu0 }
  0xc7   :  { %v77_v8 = vadd.f32 %v232_v6, %v76_v7 }
  0xc8   :  { %v249_v9 = vpop.f32.mrf.mxu0 }
  0xc9   :  { %v84_v10 = vsel %vm83_vm3, %v77_v8, 0.0 }
  0xca   :  { %85 = vadd.xlane.f32.xlu0 %v84_v10  ;;  %v79_v11 = vpop.f32.mrf.mxu0 }
  0xcb   :  { %v80_v12 = vadd.f32 %v232_v6, %v79_v11 }
  0xcc   :  { %v250_v13 = vpop.f32.mrf.mxu0 }
  0xcd   :  { %v87_v14 = vsel %vm83_vm3, %v80_v12, 0.0 }
  0xce   :  { %88 = vadd.xlane.f32.xlu0 %v87_v14 }
 0x153   :  { %v86_v15 = vpop.xlane.xlu0 %85 }
 0x154   :  { %v91_v16 = vmul.f32 0.015625, %v86_v15 }
 0x156   :  { %v93_v17 = vsub.f32 %v77_v8, %v91_v16 }
 0x157   :  { %v89_v18 = vpop.xlane.xlu0 %88 }
 0x158   :  { %v92_v19 = vmul.f32 0.015625, %v89_v18  ;;  %v95_v20 = vmul.f32 %v93_v17, %v93_v17 }
 0x15a   :  { %v94_v21 = vsub.f32 %v80_v12, %v92_v19  ;;  %v97_v22 = vsel %vm83_vm3, %v95_v20, 0.0 }
 0x15b   :  { %98 = vadd.xlane.f32.xlu1 %v97_v22 }
 0x15c   :  { %v96_v23 = vmul.f32 %v94_v21, %v94_v21 }
 0x15e   :  { %v100_v24 = vsel %vm83_vm3, %v96_v23, 0.0 }
 0x15f   :  { %101 = vadd.xlane.f32.xlu1 %v100_v24 }
 0x1e4   :  { %v99_v34 = vpop.xlane.xlu1 %98 }
 0x1e5   :  { %v103_v35 = vmul.f32 0.015625, %v99_v34 }
 0x1e7   :  { %v105_v36 = vadd.f32 1e-05, %v103_v35 }
 0x1e8   :  { %v102_v37 = vpop.xlane.xlu1 %101 }
 0x1e9   :  { %266 = vrsqrt.f32 %v105_v36  ;;  %v104_v38 = vmul.f32 0.015625, %v102_v37 }
 0x1eb   :  { %v106_v39 = vadd.f32 1e-05, %v104_v38 }
 0x1ed   :  { %268 = vrsqrt.f32 %v106_v39 }
 0x1f6   :  { %v267_v40 = vpop.eup %266 }
 0x1f7   :  { %v109_v41 = vmul.f32 %v267_v40, %v93_v17 }
 0x1f9   :  { %111 = vst.msk [vmem:[%s378_s5] sm:$0xff] %vm83_vm3, %v109_v41 }
 0x1fa   :  { %v269_v42 = vpop.eup %268 }
 0x1fb   :  { %v110_v43 = vmul.f32 %v269_v42, %v94_v21 }
 0x1fd   :  { %112 = vst.msk [vmem:[%s378_s5 + $0x8] sm:$0xff] %vm83_vm3, %v110_v43  ;;  %v113_v44 = vpack.c.bf16 %v110_v43, %v109_v41 }
 0x1ff   :  { %242 = vmatmul.mubr.msk.bf16.vlgmr.msra.gmra.mxu1 %vm83_vm3, %v113_v44 }
 0x2bf   :  { %v211_v52 = vpop.f32.mrf.mxu1 }
 0x2c0   :  { %v212_v53 = vadd.f32 %v211_v52, %v127_v50 }
 0x2c1   :  { %v213_v54 = vpop.f32.mrf.mxu1 }
 0x2c2   :  { %220 = vst [vmem:[%s380_s6] sm:$0xff] %v212_v53  ;;  %v214_v55 = vadd.f32 %v213_v54, %v131_v51 }
 0x2c3   :  { %v215_v56 = vpop.f32.mrf.mxu1 }
 0x2c4   :  { %221 = vst.msk [vmem:[%s380_s6 + $0x8] sm:$0xff] %vm83_vm3, %v214_v55  ;;  %v216_v57 = vadd.f32 %v215_v56, %v127_v50 }
 0x2c5   :  { %v217_v58 = vpop.f32.mrf.mxu1 }
 0x2c6   :  { %222 = vst [vmem:[%s380_s6 + $0x10] sm:$0xff] %v216_v57  ;;  %v218_v59 = vadd.f32 %v217_v58, %v131_v51 }
 0x2c8   :  { %223 = vst.msk [vmem:[%s380_s6 + $0x18] sm:$0xff] %vm83_vm3, %v218_v59 }

// kernel: vgru_ed_forward.9
= control target key start
LH: loop header
LB: loop body
LE: loop exit
PB: predicated region body
PF: predicated region fallthrough
CT: control target
= control target key end

     0   :  { %vm22_vm0 = vcmask 523264   ;;  %v199_v14 = vmov 0.0   ;;  %vm200_vm1 = vmmov 0   ;;  %s264_s1 = inlined_call_operand.vmem [shape: f32[16,64], index: 1, kind: input, shape index: {}]   ;;  %s265_s2 = inlined_call_operand.vmem [shape: bf16[64,128], index: 2, kind: input, shape index: {}]   ;;  %s266_s0 = inlined_call_operand.vmem [shape: f32[16,64], index: 0, kind: input, shape index: {}]   ;;  %s267_s3 = inlined_call_operand.vmem [shape: f32[1,128], index: 3, kind: input, shape index: {}]   ;;  %s268_s4 = inlined_call_operand.vmem [shape: f32[16,128], index: 4, kind: output, shape index: {}]  }
   0x1   :  { %v20_v0 = vld [vmem:[%s264_s1] sm:$0xff]  ;;  %v21_v1 = vld [vmem:[%s264_s1 + $0x8] sm:$0xff]  ;;  %169 = vmatprep.subr.bf16.mxu0 %v199_v14  ;;  %v183_v15 = vld [vmem:[%s265_s2 + $0x18] sm:$0xff]   ;;  %177 = vmatprep.mubr.msk.bf16.mxu0 %vm200_vm1, %v199_v14 }
   0x2   :  { %v23_v2 = vsel %vm22_vm0, %v20_v0, 0.0  ;;  %v26_v3 = vsel %vm22_vm0, %v21_v1, 0.0  ;;  %170 = vmatpush3.bf16.msra.mxu0 %v183_v15  ;;  %v184_v16 = vld [vmem:[%s265_s2 + $0x10] sm:$0xff]   ;;  %v185_v17 = vld [vmem:[%s265_s2 + $0x8] sm:$0xff]   ;;  %v186_v18 = vld [vmem:[%s265_s2] sm:$0xff]  }
   0x3   :  { %24 = vadd.xlane.f32.xlu0 %v23_v2  ;;  %171 = vmatprep.subr.bf16.mxu0 %v199_v14  ;;  %v18_v26 = vld [vmem:[%s266_s0] sm:$0xff]  ;;  %v19_v30 = vld [vmem:[%s266_s0 + $0x8] sm:$0xff] }
   0x4   :  { %v158_v44 = vld [vmem:[%s267_s3] ss:$0 sm:$0xff] }
   0x6   :  { %172 = vmatpush3.bf16.msra.mxu0 %v184_v16 }
   0x7   :  { %27 = vadd.xlane.f32.xlu0 %v26_v3  ;;  %173 = vmatprep.subr.bf16.mxu0 %v199_v14 }
   0xa   :  { %174 = vmatpush3.bf16.msra.mxu0 %v185_v17 }
   0xb   :  { %175 = vmatprep.subr.bf16.mxu0 %v199_v14 }
   0xe   :  { %176 = vmatpush3.bf16.msra.mxu0 %v186_v18 }
  0x8c   :  { %v25_v4 = vpop.xlane.xlu0 %24 }
  0x8d   :  { %v30_v5 = vmul.f32 0.015625, %v25_v4 }
  0x8f   :  { %v32_v6 = vsub.f32 %v20_v0, %v30_v5 }
  0x90   :  { %v28_v7 = vpop.xlane.xlu0 %27 }
  0x91   :  { %v31_v8 = vmul.f32 0.015625, %v28_v7  ;;  %v34_v9 = vmul.f32 %v32_v6, %v32_v6 }
  0x93   :  { %v33_v10 = vsub.f32 %v21_v1, %v31_v8  ;;  %v36_v11 = vsel %vm22_vm0, %v34_v9, 0.0 }
  0x94   :  { %37 = vadd.xlane.f32.xlu1 %v36_v11 }
  0x95   :  { %v35_v12 = vmul.f32 %v33_v10, %v33_v10 }
  0x97   :  { %v39_v13 = vsel %vm22_vm0, %v35_v12, 0.0 }
  0x98   :  { %40 = vadd.xlane.f32.xlu1 %v39_v13 }
 0x11d   :  { %v38_v19 = vpop.xlane.xlu1 %37 }
 0x11e   :  { %v42_v20 = vmul.f32 0.015625, %v38_v19 }
 0x120   :  { %v44_v21 = vadd.f32 1e-05, %v42_v20 }
 0x121   :  { %v41_v22 = vpop.xlane.xlu1 %40 }
 0x122   :  { %187 = vrsqrt.f32 %v44_v21  ;;  %v43_v23 = vmul.f32 0.015625, %v41_v22 }
 0x124   :  { %v45_v24 = vadd.f32 1e-05, %v43_v23 }
 0x126   :  { %189 = vrsqrt.f32 %v45_v24 }
 0x12f   :  { %v188_v25 = vpop.eup %187 }
 0x130   :  { %v48_v27 = vmul.f32 %v188_v25, %v32_v6 }
 0x132   :  { %v50_v28 = vadd.f32 %v48_v27, %v18_v26 }
 0x133   :  { %v190_v29 = vpop.eup %189 }
 0x134   :  { %v49_v31 = vmul.f32 %v190_v29, %v33_v10  ;;  %v156_v32 = vmul.f32 -1.442695, %v50_v28 }
 0x136   :  { %v51_v33 = vadd.f32 %v49_v31, %v19_v30  ;;  %191 = vpow2.f32 %v156_v32 }
 0x138   :  { %v157_v34 = vmul.f32 -1.442695, %v51_v33 }
 0x13a   :  { %193 = vpow2.f32 %v157_v34 }
 0x143   :  { %v192_v35 = vpop.eup %191 }
 0x144   :  { %v58_v36 = vadd.f32 1.0, %v192_v35 }
 0x146   :  { %195 = vrcp.f32 %v58_v36 }
 0x147   :  { %v194_v37 = vpop.eup %193 }
 0x148   :  { %v59_v38 = vadd.f32 1.0, %v194_v37 }
 0x14a   :  { %197 = vrcp.f32 %v59_v38 }
 0x153   :  { %v196_v39 = vpop.eup %195 }
 0x154   :  { %v64_v41 = vmul.f32 %v196_v39, %v50_v28 }
 0x157   :  { %v198_v40 = vpop.eup %197 }
 0x158   :  { %v65_v42 = vmul.f32 %v198_v40, %v51_v33 }
 0x15a   :  { %v66_v43 = vpack.c.bf16 %v65_v42, %v64_v41 }
 0x15c   :  { %178 = vmatmul.mubr.msk.bf16.vlgmr.msra.gmra.mxu0 %vm22_vm0, %v66_v43 }
 0x21c   :  { %v143_v45 = vpop.f32.mrf.mxu0 }
 0x21d   :  { %v144_v46 = vadd.f32 %v158_v44, %v143_v45 }
 0x21e   :  { %v179_v47 = vpop.f32.mrf.mxu0 }
 0x21f   :  { %150 = vst [vmem:[%s268_s4] sm:$0xff] %v144_v46 }
 0x220   :  { %v146_v48 = vpop.f32.mrf.mxu0 }
 0x221   :  { %v147_v49 = vadd.f32 %v158_v44, %v146_v48 }
 0x222   :  { %v180_v50 = vpop.f32.mrf.mxu0 }
 0x223   :  { %151 = vst [vmem:[%s268_s4 + $0x8] sm:$0xff] %v147_v49 }

// kernel: vgru_ed_forward.7
= control target key start
LH: loop header
LB: loop body
LE: loop exit
PB: predicated region body
PF: predicated region fallthrough
CT: control target
= control target key end

     0   :  { %vm40_vm0 = vcmask 523264   ;;  %v767_v14 = vmov 0.0   ;;  %vm768_vm1 = vmmov 0   ;;  %s769_s17 = smov 64   ;;  %s1031_s1 = inlined_call_operand.vmem [shape: f32[16,64], index: 1, kind: input, shape index: {}]   ;;  %s1032_s3 = inlined_call_operand.vmem [shape: bf16[64,128], index: 3, kind: input, shape index: {}]   ;;  %s1033_s0 = inlined_call_operand.vmem [shape: f32[16,64], index: 0, kind: input, shape index: {}]   ;;  %s1034_s9 = inlined_call_operand.vmem [shape: f32[16,64], index: 9, kind: output, shape index: {0}]   ;;  %s1035_s4 = inlined_call_operand.vmem [shape: f32[1,128], index: 4, kind: input, shape index: {}]   ;;  %s1036_s5 = inlined_call_operand.vmem [shape: bf16[128,128], index: 5, kind: input, shape index: {}]   ;;  %s1037_s2 = inlined_call_operand.vmem [shape: f32[16,64], index: 2, kind: input, shape index: {}]   ;;  %s1038_s7 = inlined_call_operand.vmem [shape: bf16[64,192], index: 7, kind: input, shape index: {}]   ;;  %s1039_s6 = inlined_call_operand.vmem [shape: f32[1,128], index: 6, kind: input, shape index: {}]   ;;  %s1040_s10 = inlined_call_operand.vmem [shape: f32[16,128], index: 10, kind: output, shape index: {1}]   ;;  %s1041_s8 = inlined_call_operand.vmem [shape: f32[1,192], index: 8, kind: input, shape index: {}]   ;;  %s1042_s11 = inlined_call_operand.vmem [shape: f32[16,192], index: 11, kind: output, shape index: {2}]  }
   0x1   :  { %v38_v0 = vld [vmem:[%s1031_s1] sm:$0xff]  ;;  %v39_v1 = vld [vmem:[%s1031_s1 + $0x8] sm:$0xff]  ;;  %666 = vmatprep.subr.bf16.mxu0 %v767_v14  ;;  %v703_v15 = vld [vmem:[%s1032_s3 + $0x18] sm:$0xff]   ;;  %674 = vmatprep.mubr.msk.bf16.mxu0 %vm768_vm1, %v767_v14 }
   0x2   :  { %v41_v2 = vsel %vm40_vm0, %v38_v0, 0.0  ;;  %v44_v3 = vsel %vm40_vm0, %v39_v1, 0.0  ;;  %678 = vmatprep.subr.bf16.mxu1 %v767_v14  ;;  %694 = vmatprep.mubr.msk.bf16.mxu1 %vm768_vm1, %v767_v14  ;;  %v704_v16 = vld [vmem:[%s1032_s3 + $0x10] sm:$0xff]   ;;  %v705_v17 = vld [vmem:[%s1032_s3 + $0x8] sm:$0xff]   ;;  %v706_v18 = vld [vmem:[%s1032_s3] sm:$0xff]  }
   0x3   :  { %42 = vadd.xlane.f32.xlu0 %v41_v2  ;;  %667 = vmatpush3.bf16.msra.mxu0 %v703_v15  ;;  %v36_v26 = vld [vmem:[%s1033_s0] sm:$0xff]  ;;  %v37_v30 = vld [vmem:[%s1033_s0 + $0x8] sm:$0xff] }
   0x4   :  { %668 = vmatprep.subr.bf16.mxu0 %v767_v14  ;;  %v628_v44 = vld [vmem:[%s1035_s4] ss:$0 sm:$0xff] }
   0x7   :  { %45 = vadd.xlane.f32.xlu0 %v44_v3  ;;  %669 = vmatpush3.bf16.msra.mxu0 %v704_v16  ;;  %v707_v16 = vld [vmem:[%s1036_s5 + $0x38] sm:$0xff]  }
   0x8   :  { %670 = vmatprep.subr.bf16.mxu0 %v767_v14  ;;  %679 = vmatpush3.bf16.msra.mxu1 %v707_v16 }
   0x9   :  { %680 = vmatprep.subr.bf16.mxu1 %v767_v14 }
   0xb   :  { %671 = vmatpush3.bf16.msra.mxu0 %v705_v17  ;;  %v708_v17 = vld [vmem:[%s1036_s5 + $0x30] sm:$0xff]  }
   0xc   :  { %672 = vmatprep.subr.bf16.mxu0 %v767_v14  ;;  %681 = vmatpush3.bf16.msra.mxu1 %v708_v17 }
   0xd   :  { %682 = vmatprep.subr.bf16.mxu1 %v767_v14 }
   0xf   :  { %673 = vmatpush3.bf16.msra.mxu0 %v706_v18  ;;  %v709_v18 = vld [vmem:[%s1036_s5 + $0x28] sm:$0xff]  }
  0x10   :  { %683 = vmatpush3.bf16.msra.mxu1 %v709_v18 }
  0x11   :  { %684 = vmatprep.subr.bf16.mxu1 %v767_v14 }
  0x8c   :  { %v43_v4 = vpop.xlane.xlu0 %42 }
  0x8d   :  { %v48_v5 = vmul.f32 0.015625, %v43_v4 }
  0x8f   :  { %v50_v6 = vsub.f32 %v38_v0, %v48_v5 }
  0x90   :  { %v46_v7 = vpop.xlane.xlu0 %45 }
  0x91   :  { %v49_v8 = vmul.f32 0.015625, %v46_v7  ;;  %v52_v9 = vmul.f32 %v50_v6, %v50_v6 }
  0x93   :  { %v51_v10 = vsub.f32 %v39_v1, %v49_v8  ;;  %v54_v11 = vsel %vm40_vm0, %v52_v9, 0.0 }
  0x94   :  { %55 = vadd.xlane.f32.xlu1 %v54_v11 }
  0x95   :  { %v53_v12 = vmul.f32 %v51_v10, %v51_v10 }
  0x97   :  { %v57_v13 = vsel %vm40_vm0, %v53_v12, 0.0 }
  0x98   :  { %58 = vadd.xlane.f32.xlu1 %v57_v13 }
 0x11d   :  { %v56_v19 = vpop.xlane.xlu1 %55 }
 0x11e   :  { %v60_v20 = vmul.f32 0.015625, %v56_v19  ;;  %v710_v19 = vld [vmem:[%s1036_s5 + $0x20] sm:$0xff]  }
 0x11f   :  { %685 = vmatpush3.bf16.msra.mxu1 %v710_v19 }
 0x120   :  { %v62_v21 = vadd.f32 1e-05, %v60_v20  ;;  %v711_v20 = vld [vmem:[%s1036_s5 + $0x18] sm:$0xff]   ;;  %686 = vmatprep.subr.bf16.mxu1 %v767_v14 }
 0x121   :  { %v59_v22 = vpop.xlane.xlu1 %58 }
 0x122   :  { %727 = vrsqrt.f32 %v62_v21  ;;  %v61_v23 = vmul.f32 0.015625, %v59_v22  ;;  %v712_v21 = vld [vmem:[%s1036_s5 + $0x10] sm:$0xff]   ;;  %v713_v22 = vld [vmem:[%s1036_s5 + $0x8] sm:$0xff]  }
 0x123   :  { %687 = vmatpush3.bf16.msra.mxu1 %v711_v20 }
 0x124   :  { %v63_v24 = vadd.f32 1e-05, %v61_v23  ;;  %688 = vmatprep.subr.bf16.mxu1 %v767_v14  ;;  %v714_v23 = vld [vmem:[%s1036_s5] sm:$0xff]  }
 0x126   :  { %729 = vrsqrt.f32 %v63_v24  ;;  %v469_v24 = vld [vmem:[%s1037_s2] sm:$0xff] }
 0x127   :  { %689 = vmatpush3.bf16.msra.mxu1 %v712_v21 }
 0x128   :  { %690 = vmatprep.subr.bf16.mxu1 %v767_v14 }
 0x12b   :  { %691 = vmatpush3.bf16.msra.mxu1 %v713_v22 }
 0x12c   :  { %692 = vmatprep.subr.bf16.mxu1 %v767_v14 }
 0x12f   :  { %v728_v25 = vpop.eup %727  ;;  %693 = vmatpush3.bf16.msra.mxu1 %v714_v23 }
 0x130   :  { %v66_v27 = vmul.f32 %v728_v25, %v50_v6  ;;  %v470_v25 = vld [vmem:[%s1037_s2 + $0x8] sm:$0xff] }
 0x132   :  { %v68_v28 = vadd.f32 %v66_v27, %v36_v26 }
 0x133   :  { %v730_v29 = vpop.eup %729 }
 0x134   :  { %v67_v31 = vmul.f32 %v730_v29, %v51_v10  ;;  %v626_v32 = vmul.f32 -1.442695, %v68_v28 }
 0x136   :  { %v69_v33 = vadd.f32 %v67_v31, %v37_v30  ;;  %731 = vpow2.f32 %v626_v32 }
 0x138   :  { %v627_v34 = vmul.f32 -1.442695, %v69_v33 }
 0x13a   :  { %733 = vpow2.f32 %v627_v34 }
 0x143   :  { %v732_v35 = vpop.eup %731 }
 0x144   :  { %v76_v36 = vadd.f32 1.0, %v732_v35 }
 0x146   :  { %735 = vrcp.f32 %v76_v36 }
 0x147   :  { %v734_v37 = vpop.eup %733 }
 0x148   :  { %v77_v38 = vadd.f32 1.0, %v734_v37 }
 0x14a   :  { %737 = vrcp.f32 %v77_v38 }
 0x153   :  { %v736_v39 = vpop.eup %735 }
 0x154   :  { %v82_v40 = vmul.f32 %v736_v39, %v68_v28 }
 0x156   :  { %84 = vst.msk [vmem:[%s1034_s9] sm:$0xff] %vm40_vm0, %v82_v40 }
 0x157   :  { %v738_v41 = vpop.eup %737 }
 0x158   :  { %v83_v42 = vmul.f32 %v738_v41, %v69_v33 }
 0x15a   :  { %85 = vst.msk [vmem:[%s1034_s9 + $0x8] sm:$0xff] %vm40_vm0, %v83_v42  ;;  %v86_v43 = vpack.c.bf16 %v83_v42, %v82_v40 }
 0x15c   :  { %675 = vmatmul.mubr.msk.bf16.vlgmr.msra.gmra.mxu0 %vm40_vm0, %v86_v43 }
 0x21c   :  { %v163_v45 = vpop.f32.mrf.mxu0 }
 0x21d   :  { %v164_v46 = vadd.f32 %v628_v44, %v163_v45 }
 0x21e   :  { %v676_v47 = vpop.f32.mrf.mxu0 }
 0x21f   :  { %252 = vrot.lane.b32.xlu0 %v164_v46, %s769_s17  ;;  %v170_v56 = vsel %vm40_vm0, %v164_v46, 0.0 }
 0x220   :  { %v166_v48 = vpop.f32.mrf.mxu0 }
 0x221   :  { %v167_v49 = vadd.f32 %v628_v44, %v166_v48 }
 0x222   :  { %v677_v50 = vpop.f32.mrf.mxu0 }
 0x223   :  { %254 = vrot.lane.b32.xlu1 %v167_v49, %s769_s17  ;;  %v173_v55 = vsel %vm40_vm0, %v167_v49, 0.0 }
 0x291   :  { %v253_v51 = vpop.permute.xlu0 %252 }
 0x292   :  { %v258_v52 = vsel %vm40_vm0, %v253_v51, 0.0 }
 0x293   :  { %259 = vadd.xlane.f32.xlu1 %v258_v52 }
 0x295   :  { %v255_v53 = vpop.permute.xlu1 %254 }
 0x296   :  { %v261_v54 = vsel %vm40_vm0, %v255_v53, 0.0 }
 0x297   :  { %262 = vadd.xlane.f32.xlu0 %v261_v54  ;;  %174 = vadd.xlane.f32.xlu1 %v173_v55 }
 0x29b   :  { %171 = vadd.xlane.f32.xlu0 %v170_v56 }
 0x31c   :  { %v260_v57 = vpop.xlane.xlu1 %259 }
 0x31d   :  { %v264_v58 = vmul.f32 0.015625, %v260_v57 }
 0x31f   :  { %v885_v59 = vsub.f32 %v164_v46, %v264_v58 }
 0x320   :  { %v263_v60 = vpop.xlane.xlu0 %262  ;;  %v175_v1 = vpop.xlane.xlu1 %174 }
 0x321   :  { %v265_v61 = vmul.f32 0.015625, %v263_v60  ;;  %v268_v62 = vmul.f32 %v885_v59, %v885_v59  ;;  %v177_v2 = vmul.f32 0.015625, %v175_v1 }
 0x323   :  { %v889_v63 = vsub.f32 %v167_v49, %v265_v61  ;;  %272 = vrot.lane.b32.xlu0 %v268_v62, %s769_s17  ;;  %v179_v3 = vsub.f32 %v167_v49, %v177_v2 }
 0x324   :  { %v172_v4 = vpop.xlane.xlu0 %171 }
 0x325   :  { %v269_v0 = vmul.f32 %v889_v63, %v889_v63  ;;  %v181_v5 = vmul.f32 %v179_v3, %v179_v3  ;;  %v176_v6 = vmul.f32 0.015625, %v172_v4 }
 0x327   :  { %274 = vrot.lane.b32.xlu1 %v269_v0, %s769_s17  ;;  %v185_v7 = vsel %vm40_vm0, %v181_v5, 0.0  ;;  %v178_v8 = vsub.f32 %v164_v46, %v176_v6 }
 0x329   :  { %v180_v9 = vmul.f32 %v178_v8, %v178_v8 }
 0x32b   :  { %v182_v10 = vsel %vm40_vm0, %v180_v9, 0.0 }
 0x342   :  { %186 = vadd.xlane.f32.xlu0 %v185_v7 }
 0x34b   :  { %183 = vadd.xlane.f32.xlu1 %v182_v10 }
 0x395   :  { %v273_v11 = vpop.permute.xlu0 %272 }
 0x396   :  { %v278_v12 = vsel %vm40_vm0, %v273_v11, 0.0 }
 0x397   :  { %279 = vadd.xlane.f32.xlu0 %v278_v12 }
 0x399   :  { %v275_v13 = vpop.permute.xlu1 %274 }
 0x39a   :  { %v281_v15 = vsel %vm40_vm0, %v275_v13, 0.0 }
 0x39b   :  { %282 = vadd.xlane.f32.xlu1 %v281_v15 }
 0x3ac   :  { %475 = vrot.lane.b32.xlu1 %v470_v25, %s769_s17 }
 0x3ad   :  { %473 = vrot.lane.b32.xlu0 %v469_v24, %s769_s17 }
 0x3cb   :  { %v187_v26 = vpop.xlane.xlu0 %186 }
 0x3cc   :  { %v189_v28 = vmul.f32 0.015625, %v187_v26 }
 0x3ce   :  { %v191_v30 = vadd.f32 1e-05, %v189_v28 }
 0x3d0   :  { %739 = vrsqrt.f32 %v191_v30 }
 0x3d4   :  { %v184_v27 = vpop.xlane.xlu1 %183 }
 0x3d5   :  { %v188_v29 = vmul.f32 0.015625, %v184_v27 }
 0x3d7   :  { %v190_v31 = vadd.f32 1e-05, %v188_v29 }
 0x3d9   :  { %741 = vrsqrt.f32 %v190_v31 }
 0x3dd   :  { %v740_v14 = vpop.eup %739 }
 0x3de   :  { %v938_v33 = vmul.f32 %v740_v14, %v179_v3 }
 0x3e0   :  { %v943_v35 = vmul.f32 0.70710677, %v938_v33 }
 0x3e2   :  { %v205_v37 = vand.u32 2147483647, %v943_v35  ;;  %vm201_vm3 = vcmp.ge.f32.partialorder %v943_v35, 0.0 }
 0x3e4   :  { %v207_v39 = vmul.f32 0.3275911, %v205_v37  ;;  %v233_v5 = vsub.f32 0.0, %v205_v37 }
 0x3e6   :  { %v742_v32 = vpop.eup %741  ;;  %v209_v41 = vadd.f32 1.0, %v207_v39  ;;  %v235_v9 = vmul.f32 %v233_v5, %v205_v37 }
 0x3e7   :  { %v940_v34 = vmul.f32 %v742_v32, %v178_v8 }
 0x3e8   :  { %743 = vrcp.f32 %v209_v41  ;;  %v238_v15 = vmul.f32 1.442695, %v235_v9 }
 0x3e9   :  { %v946_v36 = vmul.f32 0.70710677, %v940_v34 }
 0x3eb   :  { %v204_v38 = vand.u32 2147483647, %v946_v36  ;;  %vm200_vm2 = vcmp.ge.f32.partialorder %v946_v36, 0.0 }
 0x3ed   :  { %v206_v40 = vmul.f32 0.3275911, %v204_v38  ;;  %v232_v6 = vsub.f32 0.0, %v204_v38 }
 0x3ef   :  { %v208_v43 = vadd.f32 1.0, %v206_v40  ;;  %v234_v10 = vmul.f32 %v232_v6, %v204_v38 }
 0x3f1   :  { %745 = vrcp.f32 %v208_v43  ;;  %v236_v16 = vmul.f32 1.442695, %v234_v10 }
 0x3f5   :  { %v744_v49 = vpop.eup %743 }
 0x3f6   :  { %v215_v53 = vmul.f32 1.0614054, %v744_v49 }
 0x3f8   :  { %v217_v60 = vadd.f32 -1.4531521, %v215_v53 }
 0x3fa   :  { %v219_v2 = vmul.f32 %v744_v49, %v217_v60 }
 0x3fe   :  { %v746_v50 = vpop.eup %745 }
 0x3ff   :  { %v214_v54 = vmul.f32 1.0614054, %v746_v50 }
 0x401   :  { %v216_v61 = vadd.f32 -1.4531521, %v214_v54 }
 0x403   :  { %v218_v3 = vmul.f32 %v746_v50, %v216_v61 }
 0x405   :  { %v220_v8 = vadd.f32 1.4214138, %v218_v3 }
 0x407   :  { %v222_v13 = vmul.f32 %v746_v50, %v220_v8 }
 0x409   :  { %v224_v20 = vadd.f32 -0.28449672, %v222_v13 }
 0x40b   :  { %v226_v26 = vmul.f32 %v746_v50, %v224_v20 }
 0x40d   :  { %v228_v32 = vadd.f32 0.2548296, %v226_v26  ;;  %v634_v26 = vld [vmem:[%s1039_s6] ss:$0 sm:$0xff] }
 0x420   :  { %v280_v42 = vpop.xlane.xlu0 %279 }
 0x421   :  { %v284_v44 = vmul.f32 0.015625, %v280_v42  ;;  %v230_v42 = vmul.f32 %v746_v50, %v228_v32 }
 0x423   :  { %v286_v45 = vadd.f32 1e-05, %v284_v44 }
 0x424   :  { %v283_v46 = vpop.xlane.xlu1 %282 }
 0x425   :  { %747 = vrsqrt.f32 %v286_v45  ;;  %v285_v47 = vmul.f32 0.015625, %v283_v46 }
 0x427   :  { %v287_v48 = vadd.f32 1e-05, %v285_v47 }
 0x429   :  { %749 = vrsqrt.f32 %v287_v48 }
 0x432   :  { %v748_v51 = vpop.eup %747 }
 0x433   :  { %v951_v52 = vmul.f32 %v748_v51, %v885_v59 }
 0x435   :  { %v954_v55 = vmul.f32 0.70710677, %v951_v52  ;;  %v292_v13 = vmul.f32 0.5, %v951_v52  ;;  %v715_v52 = vld [vmem:[%s1038_s7 + $0x30] ss:$8 sps:$4 sm:$0xff]  }
 0x436   :  { %v750_v56 = vpop.eup %749 }
 0x437   :  { %v957_v57 = vmul.f32 %v750_v56, %v889_v63  ;;  %v300_v58 = vand.u32 2147483647, %v954_v55  ;;  %v221_v63 = vadd.f32 1.4214138, %v219_v2  ;;  %vm296_vm4 = vcmp.ge.f32.partialorder %v954_v55, 0.0 }
 0x439   :  { %v961_v62 = vmul.f32 0.70710677, %v957_v57  ;;  %v302_v0 = vmul.f32 0.3275911, %v300_v58  ;;  %v328_v11 = vsub.f32 0.0, %v300_v58  ;;  %v223_v12 = vmul.f32 %v744_v49, %v221_v63 }
 0x43b   :  { %v301_v59 = vand.u32 2147483647, %v961_v62  ;;  %v304_v1 = vadd.f32 1.0, %v302_v0  ;;  %v330_v18 = vmul.f32 %v328_v11, %v300_v58  ;;  %v225_v19 = vadd.f32 -0.28449672, %v223_v12 }
 0x43c   :  { %vm297_vm5 = vcmp.ge.f32.partialorder %v961_v62, 0.0 }
 0x43d   :  { %v303_v4 = vmul.f32 0.3275911, %v301_v59  ;;  %751 = vrcp.f32 %v304_v1  ;;  %v329_v17 = vsub.f32 0.0, %v301_v59  ;;  %v332_v24 = vmul.f32 1.442695, %v330_v18 }
 0x43e   :  { %v227_v25 = vmul.f32 %v744_v49, %v225_v19  ;;  %v770_v1 = vmov -1.0   ;;  %v293_v18 = vmul.f32 0.5, %v957_v57  ;;  %v718_v57 = vld [vmem:[%s1038_s7 + $0x20] ss:$8 sps:$4 sm:$0xff]  }
 0x43f   :  { %v305_v7 = vadd.f32 1.0, %v303_v4  ;;  %v331_v23 = vmul.f32 %v329_v17, %v301_v59  ;;  %v203_v2 = vsel %vm201_vm3, 1.0, %v770_v1  ;;  %v202_v6 = vsel %vm200_vm2, 1.0, %v770_v1 }
 0x440   :  { %v229_v14 = vadd.f32 0.2548296, %v227_v25  ;;  %v298_v63 = vsel %vm296_vm4, 1.0, %v770_v1  ;;  %v299_v11 = vsel %vm297_vm5, 1.0, %v770_v1  ;;  %v196_v17 = vmul.f32 0.5, %v940_v34 }
 0x441   :  { %753 = vrcp.f32 %v305_v7  ;;  %v334_v31 = vmul.f32 1.442695, %v331_v23  ;;  %v720_v34 = vld [vmem:[%s1038_s7 + $0x24] ss:$8 sps:$4 sm:$0xff]  }
 0x442   :  { %755 = vpow2.f32 %v238_v15  ;;  %v231_v41 = vmul.f32 %v744_v49, %v229_v14 }
 0x443   :  { %757 = vpow2.f32 %v236_v16  ;;  %v197_v16 = vmul.f32 0.5, %v938_v33  ;;  %v717_v33 = vld [vmem:[%s1038_s7 + $0x34] ss:$8 sps:$4 sm:$0xff]  }
 0x444   :  { %759 = vpow2.f32 %v332_v24  ;;  %575 = vmatprep.subr.bf16.mxu0 %v717_v33 }
 0x445   :  { %761 = vpow2.f32 %v334_v31  ;;  %576 = vmatpush1.bf16.msra.mxu0 %v715_v52 }
 0x446   :  { %577 = vmatprep.subr.bf16.mxu0 %v720_v34 }
 0x449   :  { %578 = vmatpush1.bf16.msra.mxu0 %v718_v57 }
 0x44a   :  { %v752_v21 = vpop.eup %751 }
 0x44b   :  { %v310_v22 = vmul.f32 1.0614054, %v752_v21 }
 0x44d   :  { %v312_v27 = vadd.f32 -1.4531521, %v310_v22 }
 0x44e   :  { %v754_v28 = vpop.eup %753 }
 0x44f   :  { %v311_v29 = vmul.f32 1.0614054, %v754_v28  ;;  %v314_v30 = vmul.f32 %v752_v21, %v312_v27  ;;  %v756_v45 = vpop.eup %755 }
 0x450   :  { %v758_v48 = vpop.eup %757  ;;  %v241_v51 = vmul.f32 %v756_v45, %v231_v41  ;;  %v721_v41 = vld [vmem:[%s1038_s7 + $0x10] ss:$8 sps:$4 sm:$0xff]  }
 0x451   :  { %v313_v37 = vadd.f32 -1.4531521, %v311_v29  ;;  %v316_v38 = vadd.f32 1.4214138, %v314_v30  ;;  %v240_v53 = vmul.f32 %v758_v48, %v230_v42  ;;  %v760_v61 = vpop.eup %759  ;;  %v726_v42 = vld [vmem:[%s1038_s7 + $0x4] ss:$8 sps:$4 sm:$0xff]  }
 0x452   :  { %v243_v0 = vsub.f32 1.0, %v241_v51  ;;  %v762_v5 = vpop.eup %761 }
 0x453   :  { %v315_v39 = vmul.f32 %v754_v28, %v313_v37  ;;  %v318_v40 = vmul.f32 %v752_v21, %v316_v38  ;;  %v242_v49 = vsub.f32 1.0, %v240_v53  ;;  %v476_v53 = vpop.permute.xlu1 %475 }
 0x454   :  { %v245_v7 = vmul.f32 %v243_v0, %v203_v2 }
 0x455   :  { %v317_v43 = vadd.f32 1.4214138, %v315_v39  ;;  %v320_v44 = vadd.f32 -0.28449672, %v318_v40  ;;  %v244_v8 = vmul.f32 %v242_v49, %v202_v6  ;;  %v723_v40 = vld [vmem:[%s1038_s7 + $0x14] ss:$8 sps:$4 sm:$0xff]  }
 0x456   :  { %v247_v55 = vadd.f32 1.0, %v245_v7  ;;  %579 = vmatprep.subr.bf16.mxu0 %v723_v40  ;;  %v512_v6 = vld [vmem:[%s1041_s8] sm:$0x3] }
 0x457   :  { %v319_v46 = vmul.f32 %v754_v28, %v317_v43  ;;  %v322_v47 = vmul.f32 %v752_v21, %v320_v44  ;;  %v246_v12 = vadd.f32 1.0, %v244_v8  ;;  %580 = vmatpush1.bf16.msra.mxu0 %v721_v41  ;;  %v724_v43 = vld [vmem:[%s1038_s7] ss:$8 sps:$4 sm:$0xff]   ;;  %v771_v44 = vmov 0  }
 0x458   :  { %v249_v62 = vmul.f32 %v247_v55, %v197_v16  ;;  %581 = vmatprep.subr.bf16.mxu0 %v726_v42  ;;  %599 = vmatprep.mubr.bf16.mxu0 %v771_v44 }
 0x459   :  { %v321_v54 = vadd.f32 -0.28449672, %v319_v46  ;;  %v324_v56 = vadd.f32 0.2548296, %v322_v47  ;;  %v474_v46 = vpop.permute.xlu0 %473 }
 0x45b   :  { %v323_v58 = vmul.f32 %v754_v28, %v321_v54  ;;  %v326_v60 = vmul.f32 %v752_v21, %v324_v56  ;;  %v248_v21 = vmul.f32 %v246_v12, %v196_v17  ;;  %582 = vmatpush1.bf16.msra.mxu0 %v724_v43 }
 0x45d   :  { %v325_v50 = vadd.f32 0.2548296, %v323_v58  ;;  %v336_v59 = vmul.f32 %v760_v61, %v326_v60 }
 0x45f   :  { %v327_v3 = vmul.f32 %v754_v28, %v325_v50  ;;  %v338_v4 = vsub.f32 1.0, %v336_v59 }
 0x461   :  { %v337_v36 = vmul.f32 %v762_v5, %v327_v3  ;;  %v340_v9 = vmul.f32 %v338_v4, %v298_v63  ;;  %v514_v3 = vlaneseq }
 0x463   :  { %v339_v35 = vsub.f32 1.0, %v337_v36  ;;  %v342_v10 = vadd.f32 1.0, %v340_v9  ;;  %v515_v4 = vshrl.u32 %v514_v3, 7 }
 0x465   :  { %v341_v15 = vmul.f32 %v339_v35, %v299_v11  ;;  %v344_v20 = vmul.f32 %v342_v10, %v292_v13  ;;  %v516_v5 = vsub.s32 0, %v515_v4  ;;  %v520_v7 = vsub.s32 1, %v515_v4 }
 0x467   :  { %v343_v19 = vadd.f32 1.0, %v341_v15  ;;  %v346_v23 = vsel %vm40_vm0, %v248_v21, %v344_v20  ;;  %v517_v63 = vrot.slane %v512_v6, %v516_v5  ;;  %v521_v8 = vrot.slane %v512_v6, %v520_v7 }
 0x469   :  { %v345_v22 = vmul.f32 %v343_v19, %v293_v18 }
 0x46b   :  { %v347_v24 = vsel %vm40_vm0, %v249_v62, %v345_v22 }
 0x46c   :  { %v348_v25 = vpack.c.bf16 %v347_v24, %v346_v23 }
 0x46e   :  { %695 = vmatmul.mubr.bf16.vlgmr.msra.gmra.mxu1 %v348_v25 }
 0x52e   :  { %v454_v27 = vpop.f32.mrf.mxu1 }
 0x52f   :  { %v455_v28 = vadd.f32 %v634_v26, %v454_v27 }
 0x530   :  { %v696_v29 = vpop.f32.mrf.mxu1 }
 0x531   :  { %v461_v30 = vmul.f32 0.5, %v455_v28 }
 0x532   :  { %v457_v31 = vpop.f32.mrf.mxu1 }
 0x533   :  { %v463_v14 = vmul.f32 1.442695, %v461_v30  ;;  %v458_v32 = vadd.f32 %v634_v26, %v457_v31 }
 0x534   :  { %v697_v37 = vpop.f32.mrf.mxu1 }
 0x535   :  { %v462_v38 = vmul.f32 0.5, %v458_v32  ;;  %763 = vpow2.f32 %v463_v14 }
 0x537   :  { %v465_v39 = vmul.f32 1.442695, %v462_v38 }
 0x539   :  { %765 = vpow2.f32 %v465_v39 }
 0x542   :  { %v764_v45 = vpop.eup %763 }
 0x543   :  { %v467_v47 = vadd.f32 1e-05, %v764_v45 }
 0x545   :  { %v479_v48 = vmul.f32 %v474_v46, %v467_v47 }
 0x546   :  { %v766_v51 = vpop.eup %765 }
 0x547   :  { %483 = vrot.lane.b32.xlu1 %v479_v48, %s769_s17  ;;  %v468_v54 = vadd.f32 1e-05, %v766_v51 }
 0x549   :  { %v480_v56 = vmul.f32 %v476_v53, %v468_v54 }
 0x54b   :  { %485 = vrot.lane.b32.xlu1 %v480_v56, %s769_s17 }
 0x5b9   :  { %v484_v58 = vpop.permute.xlu1 %483 }
 0x5ba   :  { %v489_v60 = vadd.f32 %v484_v58, %v455_v28 }
 0x5bc   :  { %493 = vrot.lane.b32.xlu0 %v489_v60, %s769_s17 }
 0x5bd   :  { %v486_v61 = vpop.permute.xlu1 %485 }
 0x5be   :  { %v490_v0 = vadd.f32 %v486_v61, %v458_v32 }
 0x5c0   :  { %v503_v49 = vpack.c.bf16 %v490_v0, %v489_v60  ;;  %495 = vrot.lane.b32.xlu1 %v490_v0, %s769_s17 }
 0x5c2   :  { %651 = vmatmul.mubr.msk.bf16.vlgmr.msra.gmra.mxu0 %vm40_vm0, %v503_v49 }
 0x62e   :  { %v494_v50 = vpop.permute.xlu0 %493 }
 0x62f   :  { %v499_v59 = vsel %vm40_vm0, %v455_v28, %v494_v50 }
 0x630   :  { %501 = vst [vmem:[%s1040_s10] sm:$0xff] %v499_v59 }
 0x632   :  { %v496_v1 = vpop.permute.xlu1 %495 }
 0x633   :  { %v500_v2 = vsel %vm40_vm0, %v458_v32, %v496_v1 }
 0x634   :  { %502 = vst [vmem:[%s1040_s10 + $0x8] sm:$0xff] %v500_v2 }
 0x682   :  { %v601_v36 = vpop.f32.mrf.mxu0 }
 0x683   :  { %v602_v9 = vadd.f32 %v601_v36, %v517_v63 }
 0x684   :  { %v603_v35 = vpop.f32.mrf.mxu0 }
 0x685   :  { %610 = vst [vmem:[%s1042_s11] sm:$0xff] %v602_v9  ;;  %v604_v10 = vadd.f32 %v603_v35, %v521_v8 }
 0x686   :  { %v605_v11 = vpop.f32.mrf.mxu0 }
 0x687   :  { %611 = vst.msk [vmem:[%s1042_s11 + $0x8] sm:$0xff] %vm40_vm0, %v604_v10  ;;  %v606_v12 = vadd.f32 %v605_v11, %v517_v63 }
 0x688   :  { %v607_v55 = vpop.f32.mrf.mxu0 }
 0x689   :  { %612 = vst [vmem:[%s1042_s11 + $0x10] sm:$0xff] %v606_v12  ;;  %v608_v13 = vadd.f32 %v607_v55, %v521_v8 }
 0x68b   :  { %613 = vst.msk [vmem:[%s1042_s11 + $0x18] sm:$0xff] %vm40_vm0, %v608_v13 }

</bundles_post_ra>
